<compile_context>
chip_gen: v5e
topology: v5e:2x2
jax: 0.10.0
libtpu: 0.0.40
codegen_flags: <defaults>
</compile_context>

<pallas_src>
import functools

import numpy as np
import jax
import jax.numpy as jnp
from jax.experimental import pallas as pl
from jax.experimental.pallas import tpu as pltpu


def _round_up(v, m):
    return (v + m - 1) // m * m


# ----------------------------------------------------------------------------
# Synthetic parameters (PyTorch layout) + one-time preparation.
# ----------------------------------------------------------------------------
def _bn_fold(gamma, beta, mean, var, eps=1e-5):
    s = gamma * jax.lax.rsqrt(var + eps)
    return s, beta - mean * s


def init_params(key, filter_widths, channels):
    """Deterministic synthetic parameters (not a checkpoint), PyTorch layout."""
    other = channels // 2
    in_channels = 17 * 5 + 21 * 2  # 127
    keys = iter(jax.random.split(key, 256))

    def conv_w(co, ci, k):
        return 0.1 * jax.random.normal(next(keys), (co, ci, k), jnp.float32)

    def bn(c):
        gamma = 1.0 + 0.1 * jax.random.normal(next(keys), (c,), jnp.float32)
        beta = 0.1 * jax.random.normal(next(keys), (c,), jnp.float32)
        mean = 0.1 * jax.random.normal(next(keys), (c,), jnp.float32)
        var = 0.5 + jax.random.uniform(next(keys), (c,), jnp.float32)
        return _bn_fold(gamma, beta, mean, var)

    p = {
        'expand_conv_w': conv_w(channels, in_channels, filter_widths[0]),
        'expand_bn': bn(channels),
        'expand_conv_angle_w': conv_w(other, in_channels, filter_widths[0]),
        'expand_bn_angle': bn(other),
        'layers_conv_w': [], 'layers_bn': [],
        'layers_conv_angle_w': [], 'layers_bn_angle': [],
    }
    for i in range(1, len(filter_widths)):
        p['layers_conv_w'].append(conv_w(channels, channels, filter_widths[i]))
        p['layers_bn'].append(bn(channels))
        p['layers_conv_w'].append(conv_w(channels, channels + other, 1))
        p['layers_bn'].append(bn(channels))
        p['layers_conv_angle_w'].append(conv_w(other, other, filter_widths[i]))
        p['layers_bn_angle'].append(bn(other))
        p['layers_conv_angle_w'].append(conv_w(other, other, 1))
        p['layers_bn_angle'].append(bn(other))
    p['shrink_angle_w'] = conv_w(16 * 3, other, 1)
    p['shrink_angle_b'] = 0.1 * jax.random.normal(next(keys), (16 * 3,), jnp.float32)
    p['shrink_w'] = conv_w(17 * 3, channels, 1)
    p['shrink_b'] = 0.1 * jax.random.normal(next(keys), (17 * 3,), jnp.float32)
    return p


def prepare_params(raw, filter_widths, channels, t_in):
    """One-time prep (hoisted out of forward): fold eval-mode BN into per-channel
    scale/shift, transpose conv weights to (K, N) bf16, and build the one-hot
    strided time-selection matrices (rows padded up to the sublane tile of 8)."""
    fws = tuple(int(f) for f in filter_widths)
    L = len(fws)

    # True time length per level (PyTorch Conv1d, kernel=stride=fw) and the
    # padded row count carried inside the kernel.
    Ts = [int(t_in)]
    for fw in fws:
        Ts.append((Ts[-1] - fw) // fw + 1)
    Rs = [Ts[0]] + [_round_up(t, 8) for t in Ts[1:]]

    def w_taps(w_oik):  # (C_out, C_in, K) -> K x (C_in, C_out) bf16
        return [jnp.asarray(jnp.transpose(w_oik[:, :, k]), jnp.bfloat16)
                for k in range(w_oik.shape[2])]

    def row(v):  # (N,) -> (1, N) f32 (broadcasts over rows in the epilogue)
        return jnp.asarray(v, jnp.float32).reshape(1, -1)

    # sel[l][k] @ act  gathers rows t*fw + k of the level-l activation.
    sels = []
    for l, fw in enumerate(fws):
        mats = []
        for k in range(fw):
            m = np.zeros((Rs[l + 1], Rs[l]), np.float32)
            t = np.arange(Ts[l + 1])
            m[t, t * fw + k] = 1.0
            mats.append(jnp.asarray(m))
        sels.append(mats)

    struct = {
        'sels': sels,
        'expand': {'w': w_taps(raw['expand_conv_w']),
                   's': row(raw['expand_bn'][0]), 'b': row(raw['expand_bn'][1])},
        'expand_angle': {'w': w_taps(raw['expand_conv_angle_w']),
                         's': row(raw['expand_bn_angle'][0]),
                         'b': row(raw['expand_bn_angle'][1])},
        'shrink_angle': {'w': jnp.asarray(
                             jnp.transpose(raw['shrink_angle_w'][:, :, 0]), jnp.bfloat16),
                         'b': row(raw['shrink_angle_b'])},
        'shrink': {'w': jnp.asarray(
                       jnp.transpose(raw['shrink_w'][:, :, 0]), jnp.bfloat16),
                   'b': row(raw['shrink_b'])},
        'layers': [],
    }
    for i in range(L - 1):
        w_p = jnp.transpose(raw['layers_conv_w'][2 * i + 1][:, :, 0])  # (ch+other, ch)
        struct['layers'].append({
            'w_t': w_taps(raw['layers_conv_w'][2 * i]),
            's_t': row(raw['layers_bn'][2 * i][0]),
            'b_t': row(raw['layers_bn'][2 * i][1]),
            # 1x1 conv over concat([x, x_angle]) split into two weight blocks.
            'w_px': jnp.asarray(w_p[:channels, :], jnp.bfloat16),
            'w_pa': jnp.asarray(w_p[channels:, :], jnp.bfloat16),
            's_p': row(raw['layers_bn'][2 * i + 1][0]),
            'b_p': row(raw['layers_bn'][2 * i + 1][1]),
            'w_ta': w_taps(raw['layers_conv_angle_w'][2 * i]),
            's_ta': row(raw['layers_bn_angle'][2 * i][0]),
            'b_ta': row(raw['layers_bn_angle'][2 * i][1]),
            'w_pa1': jnp.asarray(
                jnp.transpose(raw['layers_conv_angle_w'][2 * i + 1][:, :, 0]), jnp.bfloat16),
            's_pa1': row(raw['layers_bn_angle'][2 * i + 1][0]),
            'b_pa1': row(raw['layers_bn_angle'][2 * i + 1][1]),
        })

    leaves, treedef = jax.tree_util.tree_flatten(struct)
    static = (fws, tuple(Ts), treedef, len(leaves))
    return {'static': static, 'leaves': leaves}


# ----------------------------------------------------------------------------
# The single fused kernel (one grid step per batch element).
# ----------------------------------------------------------------------------
def _make_kernel(fws, Ts, treedef, n_leaves):
    L = len(fws)

    def kernel(x_ref, *refs):
        p = jax.tree_util.tree_unflatten(treedef, refs[:n_leaves])
        out_refs = refs[n_leaves:]
        sels = p['sels']

        def dot16(a, b):  # bf16 MXU operands, f32 accumulation
            return jnp.dot(a.astype(jnp.bfloat16), b.astype(jnp.bfloat16),
                           preferred_element_type=jnp.float32)

        def bn_relu(y, s_ref, b_ref):  # folded eval-mode BN + ReLU, f32 epilogue
            return jnp.maximum(y * s_ref[...] + b_ref[...], 0.0)

        def strided_conv(xv, sel_refs, w_refs, s_ref, b_ref):
            # Conv1d(kernel=fw, stride=fw, bias=False) + BN + ReLU:
            #   y[t] = relu(bn(sum_k x[t*fw + k] @ W_k))
            acc = None
            for s_m, w_m in zip(sel_refs, w_refs):
                term = dot16(dot16(s_m[...], xv), w_m[...])
                acc = term if acc is None else acc + term
            return bn_relu(acc, s_ref, b_ref)

        w_sa = p['shrink_angle']['w'][...]
        b_sa = p['shrink_angle']['b'][...]

        # TODO(synk): nn.Dropout layers are identity (eval-mode forward) and
        # BatchNorm uses folded running statistics (eval mode, no stat updates).
        x = x_ref[0]                                        # (T0, 127) f32
        x_angle = strided_conv(x, sels[0], p['expand_angle']['w'],
                               p['expand_angle']['s'], p['expand_angle']['b'])
        xm = strided_conv(x, sels[0], p['expand']['w'],
                          p['expand']['s'], p['expand']['b'])

        out_refs[0][0] = (dot16(x_angle, w_sa) + b_sa)[:Ts[1]]

        for i, lay in enumerate(p['layers']):
            fw = fws[i + 1]
            s_mid = sels[i + 1][fw // 2][...]
            res = dot16(s_mid, xm)               # xm[:, fw//2::fw, :]
            res_angle = dot16(s_mid, x_angle)

            x_angle = strided_conv(x_angle, sels[i + 1], lay['w_ta'],
                                   lay['s_ta'], lay['b_ta'])
            x_angle = res_angle + bn_relu(dot16(x_angle, lay['w_pa1'][...]),
                                          lay['s_pa1'], lay['b_pa1'])
            out_refs[1 + i][0] = (dot16(x_angle, w_sa) + b_sa)[:Ts[i + 2]]

            xm = strided_conv(xm, sels[i + 1], lay['w_t'], lay['s_t'], lay['b_t'])
            # conv1x1(concat([xm, x_angle], channel)) done with split weights.
            y = dot16(xm, lay['w_px'][...]) + dot16(x_angle, lay['w_pa'][...])
            xm = res + bn_relu(y, lay['s_p'], lay['b_p'])

        # TODO(synk): reference forward has debug `print(x.shape); exit()` before
        # returning; omitted (intended return semantics preserved).
        out_refs[L][0] = (dot16(xm, p['shrink']['w'][...])
                          + p['shrink']['b'][...])[:Ts[L]]

    return kernel


@functools.partial(jax.jit, static_argnums=(0,))
def _forward_impl(static, leaves, pos_3d, pos_2d, bone_angle):
    fws, Ts, treedef, n_leaves = static
    L = len(fws)
    B, T = pos_2d.shape[:2]
    assert T == Ts[0], (T, Ts)

    x = jnp.concatenate([
        pos_3d.reshape(B, T, -1),       # (B, T, 51)
        pos_2d.reshape(B, T, -1),       # (B, T, 34)
        bone_angle.reshape(B, T, -1),   # (B, T, 42)
    ], axis=-1).astype(jnp.float32)     # (B, T, 127)
    c_in = x.shape[-1]

    def full_spec(shape):  # whole-array VMEM block, resident across grid steps
        return pl.BlockSpec(shape, lambda b: (0,) * len(shape))

    in_specs = [pl.BlockSpec((1, T, c_in), lambda b: (b, 0, 0))]
    in_specs += [full_spec(leaf.shape) for leaf in leaves]

    out_shape = tuple(jax.ShapeDtypeStruct((B, Ts[l + 1], 48), jnp.float32)
                      for l in range(L))
    out_shape += (jax.ShapeDtypeStruct((B, Ts[L], 51), jnp.float32),)
    out_specs = tuple(pl.BlockSpec((1, Ts[l + 1], 48), lambda b: (b, 0, 0))
                      for l in range(L))
    out_specs += (pl.BlockSpec((1, Ts[L], 51), lambda b: (b, 0, 0)),)

    outs = pl.pallas_call(
        _make_kernel(fws, Ts, treedef, n_leaves),
        out_shape=out_shape,
        grid=(B,),
        in_specs=in_specs,
        out_specs=out_specs,
        compiler_params=pltpu.CompilerParams(
            dimension_semantics=("parallel",)),
    )(x, *leaves)

    angles = [outs[l].reshape(B, Ts[l + 1], 16, 3) for l in range(L)]
    # Match PyTorch's (B, 51, T_final).view(-1, 17, 3) element ordering exactly.
    out = jnp.transpose(outs[L], (0, 2, 1)).reshape(-1, 17, 3)
    return out, angles


def my_video_train_model_forward(prepared, pos_3d, pos_2d, bone_angle):
    return _forward_impl(prepared['static'], prepared['leaves'],
                         pos_3d, pos_2d, bone_angle)


if __name__ == "__main__":
    filter_widths = (3, 3)   # receptive field 9 frames -> 1 output frame
    channels = 32            # small synthetic width (other_channel = 16)
    B, T = 2, 9

    key = jax.random.PRNGKey(0)
    k1, k2, k3, kp = jax.random.split(key, 4)
    pos_3d = jax.random.normal(k1, (B, T, 17, 3), jnp.float32)
    pos_2d = jax.random.normal(k2, (B, T, 17, 2), jnp.float32)
    bone_angle = jax.random.normal(k3, (B, T, 21, 2), jnp.float32)

    raw = init_params(kp, filter_widths, channels)
    prepared = prepare_params(raw, filter_widths, channels, T)   # one-time prep

    out, angles = my_video_train_model_forward(prepared, pos_3d, pos_2d, bone_angle)
    jax.block_until_ready(out)
    for a in angles:
        jax.block_until_ready(a)

    assert out.shape == (B, 17, 3), out.shape
    assert angles[0].shape == (B, 3, 16, 3), angles[0].shape
    assert angles[1].shape == (B, 1, 16, 3), angles[1].shape
    print("KERNEL_OK")
</pallas_src>

<mosaic_0001>
module attributes {stable_mosaic.version = 11 : i64} {
  func.func @kernel(%arg0: i32, %arg1: memref<1x9x127xf32, #tpu.memory_space<vmem>>, %arg2: memref<1x32xf32, #tpu.memory_space<vmem>>, %arg3: memref<1x32xf32, #tpu.memory_space<vmem>>, %arg4: memref<127x32xbf16, #tpu.memory_space<vmem>>, %arg5: memref<127x32xbf16, #tpu.memory_space<vmem>>, %arg6: memref<127x32xbf16, #tpu.memory_space<vmem>>, %arg7: memref<1x16xf32, #tpu.memory_space<vmem>>, %arg8: memref<1x16xf32, #tpu.memory_space<vmem>>, %arg9: memref<127x16xbf16, #tpu.memory_space<vmem>>, %arg10: memref<127x16xbf16, #tpu.memory_space<vmem>>, %arg11: memref<127x16xbf16, #tpu.memory_space<vmem>>, %arg12: memref<1x32xf32, #tpu.memory_space<vmem>>, %arg13: memref<1x16xf32, #tpu.memory_space<vmem>>, %arg14: memref<1x32xf32, #tpu.memory_space<vmem>>, %arg15: memref<1x16xf32, #tpu.memory_space<vmem>>, %arg16: memref<1x32xf32, #tpu.memory_space<vmem>>, %arg17: memref<1x16xf32, #tpu.memory_space<vmem>>, %arg18: memref<1x32xf32, #tpu.memory_space<vmem>>, %arg19: memref<1x16xf32, #tpu.memory_space<vmem>>, %arg20: memref<16x32xbf16, #tpu.memory_space<vmem>>, %arg21: memref<16x16xbf16, #tpu.memory_space<vmem>>, %arg22: memref<32x32xbf16, #tpu.memory_space<vmem>>, %arg23: memref<32x32xbf16, #tpu.memory_space<vmem>>, %arg24: memref<32x32xbf16, #tpu.memory_space<vmem>>, %arg25: memref<32x32xbf16, #tpu.memory_space<vmem>>, %arg26: memref<16x16xbf16, #tpu.memory_space<vmem>>, %arg27: memref<16x16xbf16, #tpu.memory_space<vmem>>, %arg28: memref<16x16xbf16, #tpu.memory_space<vmem>>, %arg29: memref<8x9xf32, #tpu.memory_space<vmem>>, %arg30: memref<8x9xf32, #tpu.memory_space<vmem>>, %arg31: memref<8x9xf32, #tpu.memory_space<vmem>>, %arg32: memref<8x8xf32, #tpu.memory_space<vmem>>, %arg33: memref<8x8xf32, #tpu.memory_space<vmem>>, %arg34: memref<8x8xf32, #tpu.memory_space<vmem>>, %arg35: memref<1x51xf32, #tpu.memory_space<vmem>>, %arg36: memref<32x51xbf16, #tpu.memory_space<vmem>>, %arg37: memref<1x48xf32, #tpu.memory_space<vmem>>, %arg38: memref<16x48xbf16, #tpu.memory_space<vmem>>, %arg39: memref<1x3x48xf32, #tpu.memory_space<vmem>>, %arg40: memref<1x1x48xf32, #tpu.memory_space<vmem>>, %arg41: memref<1x1x51xf32, #tpu.memory_space<vmem>>) attributes {dimension_semantics = [#tpu.dimension_semantics<parallel>], iteration_bounds = array<i64: 2>, scalar_prefetch = 0 : i64, scratch_operands = 0 : i64, tpu.core_type = #tpu.core_type<tc>, window_params = [{transform_indices = @transform_0, window_bounds = array<i64: 1, 9, 127>}, {pipeline_mode = #tpu.pipeline_mode<synchronous>, transform_indices = @transform_1, window_bounds = array<i64: 1, 32>}, {pipeline_mode = #tpu.pipeline_mode<synchronous>, transform_indices = @transform_2, window_bounds = array<i64: 1, 32>}, {pipeline_mode = #tpu.pipeline_mode<synchronous>, transform_indices = @transform_3, window_bounds = array<i64: 127, 32>}, {pipeline_mode = #tpu.pipeline_mode<synchronous>, transform_indices = @transform_4, window_bounds = array<i64: 127, 32>}, {pipeline_mode = #tpu.pipeline_mode<synchronous>, transform_indices = @transform_5, window_bounds = array<i64: 127, 32>}, {pipeline_mode = #tpu.pipeline_mode<synchronous>, transform_indices = @transform_6, window_bounds = array<i64: 1, 16>}, {pipeline_mode = #tpu.pipeline_mode<synchronous>, transform_indices = @transform_7, window_bounds = array<i64: 1, 16>}, {pipeline_mode = #tpu.pipeline_mode<synchronous>, transform_indices = @transform_8, window_bounds = array<i64: 127, 16>}, {pipeline_mode = #tpu.pipeline_mode<synchronous>, transform_indices = @transform_9, window_bounds = array<i64: 127, 16>}, {pipeline_mode = #tpu.pipeline_mode<synchronous>, transform_indices = @transform_10, window_bounds = array<i64: 127, 16>}, {pipeline_mode = #tpu.pipeline_mode<synchronous>, transform_indices = @transform_11, window_bounds = array<i64: 1, 32>}, {pipeline_mode = #tpu.pipeline_mode<synchronous>, transform_indices = @transform_12, window_bounds = array<i64: 1, 16>}, {pipeline_mode = #tpu.pipeline_mode<synchronous>, transform_indices = @transform_13, window_bounds = array<i64: 1, 32>}, {pipeline_mode = #tpu.pipeline_mode<synchronous>, transform_indices = @transform_14, window_bounds = array<i64: 1, 16>}, {pipeline_mode = #tpu.pipeline_mode<synchronous>, transform_indices = @transform_15, window_bounds = array<i64: 1, 32>}, {pipeline_mode = #tpu.pipeline_mode<synchronous>, transform_indices = @transform_16, window_bounds = array<i64: 1, 16>}, {pipeline_mode = #tpu.pipeline_mode<synchronous>, transform_indices = @transform_17, window_bounds = array<i64: 1, 32>}, {pipeline_mode = #tpu.pipeline_mode<synchronous>, transform_indices = @transform_18, window_bounds = array<i64: 1, 16>}, {pipeline_mode = #tpu.pipeline_mode<synchronous>, transform_indices = @transform_19, window_bounds = array<i64: 16, 32>}, {pipeline_mode = #tpu.pipeline_mode<synchronous>, transform_indices = @transform_20, window_bounds = array<i64: 16, 16>}, {pipeline_mode = #tpu.pipeline_mode<synchronous>, transform_indices = @transform_21, window_bounds = array<i64: 32, 32>}, {pipeline_mode = #tpu.pipeline_mode<synchronous>, transform_indices = @transform_22, window_bounds = array<i64: 32, 32>}, {pipeline_mode = #tpu.pipeline_mode<synchronous>, transform_indices = @transform_23, window_bounds = array<i64: 32, 32>}, {pipeline_mode = #tpu.pipeline_mode<synchronous>, transform_indices = @transform_24, window_bounds = array<i64: 32, 32>}, {pipeline_mode = #tpu.pipeline_mode<synchronous>, transform_indices = @transform_25, window_bounds = array<i64: 16, 16>}, {pipeline_mode = #tpu.pipeline_mode<synchronous>, transform_indices = @transform_26, window_bounds = array<i64: 16, 16>}, {pipeline_mode = #tpu.pipeline_mode<synchronous>, transform_indices = @transform_27, window_bounds = array<i64: 16, 16>}, {pipeline_mode = #tpu.pipeline_mode<synchronous>, transform_indices = @transform_28, window_bounds = array<i64: 8, 9>}, {pipeline_mode = #tpu.pipeline_mode<synchronous>, transform_indices = @transform_29, window_bounds = array<i64: 8, 9>}, {pipeline_mode = #tpu.pipeline_mode<synchronous>, transform_indices = @transform_30, window_bounds = array<i64: 8, 9>}, {pipeline_mode = #tpu.pipeline_mode<synchronous>, transform_indices = @transform_31, window_bounds = array<i64: 8, 8>}, {pipeline_mode = #tpu.pipeline_mode<synchronous>, transform_indices = @transform_32, window_bounds = array<i64: 8, 8>}, {pipeline_mode = #tpu.pipeline_mode<synchronous>, transform_indices = @transform_33, window_bounds = array<i64: 8, 8>}, {pipeline_mode = #tpu.pipeline_mode<synchronous>, transform_indices = @transform_34, window_bounds = array<i64: 1, 51>}, {pipeline_mode = #tpu.pipeline_mode<synchronous>, transform_indices = @transform_35, window_bounds = array<i64: 32, 51>}, {pipeline_mode = #tpu.pipeline_mode<synchronous>, transform_indices = @transform_36, window_bounds = array<i64: 1, 48>}, {pipeline_mode = #tpu.pipeline_mode<synchronous>, transform_indices = @transform_37, window_bounds = array<i64: 16, 48>}, {transform_indices = @transform_38, window_bounds = array<i64: 1, 3, 48>}, {transform_indices = @transform_39, window_bounds = array<i64: 1, 1, 48>}, {transform_indices = @transform_40, window_bounds = array<i64: 1, 1, 51>}]} {
    %c0 = arith.constant 0 : index
    %c0_0 = arith.constant 0 : index
    %0 = vector.load %arg38[%c0, %c0_0] : memref<16x48xbf16, #tpu.memory_space<vmem>>, vector<16x48xbf16>
    %c0_1 = arith.constant 0 : index
    %c0_2 = arith.constant 0 : index
    %1 = vector.load %arg37[%c0_1, %c0_2] : memref<1x48xf32, #tpu.memory_space<vmem>>, vector<1x48xf32>
    %c0_3 = arith.constant 0 : index
    %c0_4 = arith.constant 0 : index
    %c0_5 = arith.constant 0 : index
    %2 = vector.load %arg1[%c0_3, %c0_4, %c0_5] : memref<1x9x127xf32, #tpu.memory_space<vmem>>, vector<1x9x127xf32>
    %3 = vector.shape_cast %2 : vector<1x9x127xf32> to vector<9x127xf32>
    %c0_6 = arith.constant 0 : index
    %c0_7 = arith.constant 0 : index
    %4 = vector.load %arg29[%c0_6, %c0_7] : memref<8x9xf32, #tpu.memory_space<vmem>>, vector<8x9xf32>
    %5 = arith.truncf %4 : vector<8x9xf32> to vector<8x9xbf16>
    %6 = arith.truncf %3 : vector<9x127xf32> to vector<9x127xbf16>
    %cst = arith.constant dense<0.000000e+00> : vector<8x127xf32>
    %7 = tpu.matmul %5, %6, %cst {dimension_numbers = #tpu.dot_dimension_numbers<[1], [0], [0], [1], [0, 0, 1, 1], [], []>} : vector<8x9xbf16>, vector<9x127xbf16>, vector<8x127xf32> -> vector<8x127xf32>
    %c0_8 = arith.constant 0 : index
    %c0_9 = arith.constant 0 : index
    %8 = vector.load %arg9[%c0_8, %c0_9] : memref<127x16xbf16, #tpu.memory_space<vmem>>, vector<127x16xbf16>
    %9 = arith.truncf %7 : vector<8x127xf32> to vector<8x127xbf16>
    %cst_10 = arith.constant dense<0.000000e+00> : vector<8x16xf32>
    %10 = tpu.matmul %9, %8, %cst_10 {dimension_numbers = #tpu.dot_dimension_numbers<[1], [0], [0], [1], [0, 0, 1, 1], [], []>} : vector<8x127xbf16>, vector<127x16xbf16>, vector<8x16xf32> -> vector<8x16xf32>
    %c0_11 = arith.constant 0 : index
    %c0_12 = arith.constant 0 : index
    %11 = vector.load %arg30[%c0_11, %c0_12] : memref<8x9xf32, #tpu.memory_space<vmem>>, vector<8x9xf32>
    %12 = arith.truncf %11 : vector<8x9xf32> to vector<8x9xbf16>
    %13 = arith.truncf %3 : vector<9x127xf32> to vector<9x127xbf16>
    %cst_13 = arith.constant dense<0.000000e+00> : vector<8x127xf32>
    %14 = tpu.matmul %12, %13, %cst_13 {dimension_numbers = #tpu.dot_dimension_numbers<[1], [0], [0], [1], [0, 0, 1, 1], [], []>} : vector<8x9xbf16>, vector<9x127xbf16>, vector<8x127xf32> -> vector<8x127xf32>
    %c0_14 = arith.constant 0 : index
    %c0_15 = arith.constant 0 : index
    %15 = vector.load %arg10[%c0_14, %c0_15] : memref<127x16xbf16, #tpu.memory_space<vmem>>, vector<127x16xbf16>
    %16 = arith.truncf %14 : vector<8x127xf32> to vector<8x127xbf16>
    %cst_16 = arith.constant dense<0.000000e+00> : vector<8x16xf32>
    %17 = tpu.matmul %16, %15, %cst_16 {dimension_numbers = #tpu.dot_dimension_numbers<[1], [0], [0], [1], [0, 0, 1, 1], [], []>} : vector<8x127xbf16>, vector<127x16xbf16>, vector<8x16xf32> -> vector<8x16xf32>
    %18 = arith.addf %10, %17 : vector<8x16xf32>
    %c0_17 = arith.constant 0 : index
    %c0_18 = arith.constant 0 : index
    %19 = vector.load %arg31[%c0_17, %c0_18] : memref<8x9xf32, #tpu.memory_space<vmem>>, vector<8x9xf32>
    %20 = arith.truncf %19 : vector<8x9xf32> to vector<8x9xbf16>
    %21 = arith.truncf %3 : vector<9x127xf32> to vector<9x127xbf16>
    %cst_19 = arith.constant dense<0.000000e+00> : vector<8x127xf32>
    %22 = tpu.matmul %20, %21, %cst_19 {dimension_numbers = #tpu.dot_dimension_numbers<[1], [0], [0], [1], [0, 0, 1, 1], [], []>} : vector<8x9xbf16>, vector<9x127xbf16>, vector<8x127xf32> -> vector<8x127xf32>
    %c0_20 = arith.constant 0 : index
    %c0_21 = arith.constant 0 : index
    %23 = vector.load %arg11[%c0_20, %c0_21] : memref<127x16xbf16, #tpu.memory_space<vmem>>, vector<127x16xbf16>
    %24 = arith.truncf %22 : vector<8x127xf32> to vector<8x127xbf16>
    %cst_22 = arith.constant dense<0.000000e+00> : vector<8x16xf32>
    %25 = tpu.matmul %24, %23, %cst_22 {dimension_numbers = #tpu.dot_dimension_numbers<[1], [0], [0], [1], [0, 0, 1, 1], [], []>} : vector<8x127xbf16>, vector<127x16xbf16>, vector<8x16xf32> -> vector<8x16xf32>
    %26 = arith.addf %18, %25 : vector<8x16xf32>
    %c0_23 = arith.constant 0 : index
    %c0_24 = arith.constant 0 : index
    %27 = vector.load %arg8[%c0_23, %c0_24] : memref<1x16xf32, #tpu.memory_space<vmem>>, vector<1x16xf32>
    %28 = vector.broadcast %27 : vector<1x16xf32> to vector<8x16xf32>
    %29 = arith.mulf %26, %28 : vector<8x16xf32>
    %c0_25 = arith.constant 0 : index
    %c0_26 = arith.constant 0 : index
    %30 = vector.load %arg7[%c0_25, %c0_26] : memref<1x16xf32, #tpu.memory_space<vmem>>, vector<1x16xf32>
    %31 = vector.broadcast %30 : vector<1x16xf32> to vector<8x16xf32>
    %32 = arith.addf %29, %31 : vector<8x16xf32>
    %cst_27 = arith.constant 0.000000e+00 : f32
    %33 = vector.broadcast %cst_27 : f32 to vector<8x16xf32>
    %34 = arith.maximumf %32, %33 : vector<8x16xf32>
    %c0_28 = arith.constant 0 : index
    %c0_29 = arith.constant 0 : index
    %35 = vector.load %arg29[%c0_28, %c0_29] : memref<8x9xf32, #tpu.memory_space<vmem>>, vector<8x9xf32>
    %36 = arith.truncf %35 : vector<8x9xf32> to vector<8x9xbf16>
    %37 = arith.truncf %3 : vector<9x127xf32> to vector<9x127xbf16>
    %cst_30 = arith.constant dense<0.000000e+00> : vector<8x127xf32>
    %38 = tpu.matmul %36, %37, %cst_30 {dimension_numbers = #tpu.dot_dimension_numbers<[1], [0], [0], [1], [0, 0, 1, 1], [], []>} : vector<8x9xbf16>, vector<9x127xbf16>, vector<8x127xf32> -> vector<8x127xf32>
    %c0_31 = arith.constant 0 : index
    %c0_32 = arith.constant 0 : index
    %39 = vector.load %arg4[%c0_31, %c0_32] : memref<127x32xbf16, #tpu.memory_space<vmem>>, vector<127x32xbf16>
    %40 = arith.truncf %38 : vector<8x127xf32> to vector<8x127xbf16>
    %cst_33 = arith.constant dense<0.000000e+00> : vector<8x32xf32>
    %41 = tpu.matmul %40, %39, %cst_33 {dimension_numbers = #tpu.dot_dimension_numbers<[1], [0], [0], [1], [0, 0, 1, 1], [], []>} : vector<8x127xbf16>, vector<127x32xbf16>, vector<8x32xf32> -> vector<8x32xf32>
    %c0_34 = arith.constant 0 : index
    %c0_35 = arith.constant 0 : index
    %42 = vector.load %arg30[%c0_34, %c0_35] : memref<8x9xf32, #tpu.memory_space<vmem>>, vector<8x9xf32>
    %43 = arith.truncf %42 : vector<8x9xf32> to vector<8x9xbf16>
    %44 = arith.truncf %3 : vector<9x127xf32> to vector<9x127xbf16>
    %cst_36 = arith.constant dense<0.000000e+00> : vector<8x127xf32>
    %45 = tpu.matmul %43, %44, %cst_36 {dimension_numbers = #tpu.dot_dimension_numbers<[1], [0], [0], [1], [0, 0, 1, 1], [], []>} : vector<8x9xbf16>, vector<9x127xbf16>, vector<8x127xf32> -> vector<8x127xf32>
    %c0_37 = arith.constant 0 : index
    %c0_38 = arith.constant 0 : index
    %46 = vector.load %arg5[%c0_37, %c0_38] : memref<127x32xbf16, #tpu.memory_space<vmem>>, vector<127x32xbf16>
    %47 = arith.truncf %45 : vector<8x127xf32> to vector<8x127xbf16>
    %cst_39 = arith.constant dense<0.000000e+00> : vector<8x32xf32>
    %48 = tpu.matmul %47, %46, %cst_39 {dimension_numbers = #tpu.dot_dimension_numbers<[1], [0], [0], [1], [0, 0, 1, 1], [], []>} : vector<8x127xbf16>, vector<127x32xbf16>, vector<8x32xf32> -> vector<8x32xf32>
    %49 = arith.addf %41, %48 : vector<8x32xf32>
    %c0_40 = arith.constant 0 : index
    %c0_41 = arith.constant 0 : index
    %50 = vector.load %arg31[%c0_40, %c0_41] : memref<8x9xf32, #tpu.memory_space<vmem>>, vector<8x9xf32>
    %51 = arith.truncf %50 : vector<8x9xf32> to vector<8x9xbf16>
    %52 = arith.truncf %3 : vector<9x127xf32> to vector<9x127xbf16>
    %cst_42 = arith.constant dense<0.000000e+00> : vector<8x127xf32>
    %53 = tpu.matmul %51, %52, %cst_42 {dimension_numbers = #tpu.dot_dimension_numbers<[1], [0], [0], [1], [0, 0, 1, 1], [], []>} : vector<8x9xbf16>, vector<9x127xbf16>, vector<8x127xf32> -> vector<8x127xf32>
    %c0_43 = arith.constant 0 : index
    %c0_44 = arith.constant 0 : index
    %54 = vector.load %arg6[%c0_43, %c0_44] : memref<127x32xbf16, #tpu.memory_space<vmem>>, vector<127x32xbf16>
    %55 = arith.truncf %53 : vector<8x127xf32> to vector<8x127xbf16>
    %cst_45 = arith.constant dense<0.000000e+00> : vector<8x32xf32>
    %56 = tpu.matmul %55, %54, %cst_45 {dimension_numbers = #tpu.dot_dimension_numbers<[1], [0], [0], [1], [0, 0, 1, 1], [], []>} : vector<8x127xbf16>, vector<127x32xbf16>, vector<8x32xf32> -> vector<8x32xf32>
    %57 = arith.addf %49, %56 : vector<8x32xf32>
    %c0_46 = arith.constant 0 : index
    %c0_47 = arith.constant 0 : index
    %58 = vector.load %arg3[%c0_46, %c0_47] : memref<1x32xf32, #tpu.memory_space<vmem>>, vector<1x32xf32>
    %59 = vector.broadcast %58 : vector<1x32xf32> to vector<8x32xf32>
    %60 = arith.mulf %57, %59 : vector<8x32xf32>
    %c0_48 = arith.constant 0 : index
    %c0_49 = arith.constant 0 : index
    %61 = vector.load %arg2[%c0_48, %c0_49] : memref<1x32xf32, #tpu.memory_space<vmem>>, vector<1x32xf32>
    %62 = vector.broadcast %61 : vector<1x32xf32> to vector<8x32xf32>
    %63 = arith.addf %60, %62 : vector<8x32xf32>
    %cst_50 = arith.constant 0.000000e+00 : f32
    %64 = vector.broadcast %cst_50 : f32 to vector<8x32xf32>
    %65 = arith.maximumf %63, %64 : vector<8x32xf32>
    %66 = arith.truncf %34 : vector<8x16xf32> to vector<8x16xbf16>
    %cst_51 = arith.constant dense<0.000000e+00> : vector<8x48xf32>
    %67 = tpu.matmul %66, %0, %cst_51 {dimension_numbers = #tpu.dot_dimension_numbers<[1], [0], [0], [1], [0, 0, 1, 1], [], []>} : vector<8x16xbf16>, vector<16x48xbf16>, vector<8x48xf32> -> vector<8x48xf32>
    %68 = vector.broadcast %1 : vector<1x48xf32> to vector<8x48xf32>
    %69 = arith.addf %67, %68 : vector<8x48xf32>
    %70 = vector.extract_strided_slice %69 {offsets = [0, 0], sizes = [3, 48], strides = [1, 1]} : vector<8x48xf32> to vector<3x48xf32>
    %c0_52 = arith.constant 0 : index
    %c0_53 = arith.constant 0 : index
    %c0_54 = arith.constant 0 : index
    %71 = vector.load %arg39[%c0_52, %c0_53, %c0_54] : memref<1x3x48xf32, #tpu.memory_space<vmem>>, vector<1x3x48xf32>
    %72 = vector.shape_cast %71 : vector<1x3x48xf32> to vector<3x48xf32>
    %73 = vector.shape_cast %70 : vector<3x48xf32> to vector<1x3x48xf32>
    tpu.vector_store %arg39[%c0_52, %c0_53, %c0_54], %73 {strides = array<i32>} : memref<1x3x48xf32, #tpu.memory_space<vmem>>, vector<1x3x48xf32>,
    %c0_55 = arith.constant 0 : index
    %c0_56 = arith.constant 0 : index
    %74 = vector.load %arg33[%c0_55, %c0_56] : memref<8x8xf32, #tpu.memory_space<vmem>>, vector<8x8xf32>
    %75 = arith.truncf %74 : vector<8x8xf32> to vector<8x8xbf16>
    %76 = arith.truncf %65 : vector<8x32xf32> to vector<8x32xbf16>
    %cst_57 = arith.constant dense<0.000000e+00> : vector<8x32xf32>
    %77 = tpu.matmul %75, %76, %cst_57 {dimension_numbers = #tpu.dot_dimension_numbers<[1], [0], [0], [1], [0, 0, 1, 1], [], []>} : vector<8x8xbf16>, vector<8x32xbf16>, vector<8x32xf32> -> vector<8x32xf32>
    %78 = arith.truncf %74 : vector<8x8xf32> to vector<8x8xbf16>
    %79 = arith.truncf %34 : vector<8x16xf32> to vector<8x16xbf16>
    %cst_58 = arith.constant dense<0.000000e+00> : vector<8x16xf32>
    %80 = tpu.matmul %78, %79, %cst_58 {dimension_numbers = #tpu.dot_dimension_numbers<[1], [0], [0], [1], [0, 0, 1, 1], [], []>} : vector<8x8xbf16>, vector<8x16xbf16>, vector<8x16xf32> -> vector<8x16xf32>
    %c0_59 = arith.constant 0 : index
    %c0_60 = arith.constant 0 : index
    %81 = vector.load %arg32[%c0_59, %c0_60] : memref<8x8xf32, #tpu.memory_space<vmem>>, vector<8x8xf32>
    %82 = arith.truncf %81 : vector<8x8xf32> to vector<8x8xbf16>
    %83 = arith.truncf %34 : vector<8x16xf32> to vector<8x16xbf16>
    %cst_61 = arith.constant dense<0.000000e+00> : vector<8x16xf32>
    %84 = tpu.matmul %82, %83, %cst_61 {dimension_numbers = #tpu.dot_dimension_numbers<[1], [0], [0], [1], [0, 0, 1, 1], [], []>} : vector<8x8xbf16>, vector<8x16xbf16>, vector<8x16xf32> -> vector<8x16xf32>
    %c0_62 = arith.constant 0 : index
    %c0_63 = arith.constant 0 : index
    %85 = vector.load %arg26[%c0_62, %c0_63] : memref<16x16xbf16, #tpu.memory_space<vmem>>, vector<16x16xbf16>
    %86 = arith.truncf %84 : vector<8x16xf32> to vector<8x16xbf16>
    %cst_64 = arith.constant dense<0.000000e+00> : vector<8x16xf32>
    %87 = tpu.matmul %86, %85, %cst_64 {dimension_numbers = #tpu.dot_dimension_numbers<[1], [0], [0], [1], [0, 0, 1, 1], [], []>} : vector<8x16xbf16>, vector<16x16xbf16>, vector<8x16xf32> -> vector<8x16xf32>
    %c0_65 = arith.constant 0 : index
    %c0_66 = arith.constant 0 : index
    %88 = vector.load %arg33[%c0_65, %c0_66] : memref<8x8xf32, #tpu.memory_space<vmem>>, vector<8x8xf32>
    %89 = arith.truncf %88 : vector<8x8xf32> to vector<8x8xbf16>
    %90 = arith.truncf %34 : vector<8x16xf32> to vector<8x16xbf16>
    %cst_67 = arith.constant dense<0.000000e+00> : vector<8x16xf32>
    %91 = tpu.matmul %89, %90, %cst_67 {dimension_numbers = #tpu.dot_dimension_numbers<[1], [0], [0], [1], [0, 0, 1, 1], [], []>} : vector<8x8xbf16>, vector<8x16xbf16>, vector<8x16xf32> -> vector<8x16xf32>
    %c0_68 = arith.constant 0 : index
    %c0_69 = arith.constant 0 : index
    %92 = vector.load %arg27[%c0_68, %c0_69] : memref<16x16xbf16, #tpu.memory_space<vmem>>, vector<16x16xbf16>
    %93 = arith.truncf %91 : vector<8x16xf32> to vector<8x16xbf16>
    %cst_70 = arith.constant dense<0.000000e+00> : vector<8x16xf32>
    %94 = tpu.matmul %93, %92, %cst_70 {dimension_numbers = #tpu.dot_dimension_numbers<[1], [0], [0], [1], [0, 0, 1, 1], [], []>} : vector<8x16xbf16>, vector<16x16xbf16>, vector<8x16xf32> -> vector<8x16xf32>
    %95 = arith.addf %87, %94 : vector<8x16xf32>
    %c0_71 = arith.constant 0 : index
    %c0_72 = arith.constant 0 : index
    %96 = vector.load %arg34[%c0_71, %c0_72] : memref<8x8xf32, #tpu.memory_space<vmem>>, vector<8x8xf32>
    %97 = arith.truncf %96 : vector<8x8xf32> to vector<8x8xbf16>
    %98 = arith.truncf %34 : vector<8x16xf32> to vector<8x16xbf16>
    %cst_73 = arith.constant dense<0.000000e+00> : vector<8x16xf32>
    %99 = tpu.matmul %97, %98, %cst_73 {dimension_numbers = #tpu.dot_dimension_numbers<[1], [0], [0], [1], [0, 0, 1, 1], [], []>} : vector<8x8xbf16>, vector<8x16xbf16>, vector<8x16xf32> -> vector<8x16xf32>
    %c0_74 = arith.constant 0 : index
    %c0_75 = arith.constant 0 : index
    %100 = vector.load %arg28[%c0_74, %c0_75] : memref<16x16xbf16, #tpu.memory_space<vmem>>, vector<16x16xbf16>
    %101 = arith.truncf %99 : vector<8x16xf32> to vector<8x16xbf16>
    %cst_76 = arith.constant dense<0.000000e+00> : vector<8x16xf32>
    %102 = tpu.matmul %101, %100, %cst_76 {dimension_numbers = #tpu.dot_dimension_numbers<[1], [0], [0], [1], [0, 0, 1, 1], [], []>} : vector<8x16xbf16>, vector<16x16xbf16>, vector<8x16xf32> -> vector<8x16xf32>
    %103 = arith.addf %95, %102 : vector<8x16xf32>
    %c0_77 = arith.constant 0 : index
    %c0_78 = arith.constant 0 : index
    %104 = vector.load %arg19[%c0_77, %c0_78] : memref<1x16xf32, #tpu.memory_space<vmem>>, vector<1x16xf32>
    %105 = vector.broadcast %104 : vector<1x16xf32> to vector<8x16xf32>
    %106 = arith.mulf %103, %105 : vector<8x16xf32>
    %c0_79 = arith.constant 0 : index
    %c0_80 = arith.constant 0 : index
    %107 = vector.load %arg15[%c0_79, %c0_80] : memref<1x16xf32, #tpu.memory_space<vmem>>, vector<1x16xf32>
    %108 = vector.broadcast %107 : vector<1x16xf32> to vector<8x16xf32>
    %109 = arith.addf %106, %108 : vector<8x16xf32>
    %cst_81 = arith.constant 0.000000e+00 : f32
    %110 = vector.broadcast %cst_81 : f32 to vector<8x16xf32>
    %111 = arith.maximumf %109, %110 : vector<8x16xf32>
    %c0_82 = arith.constant 0 : index
    %c0_83 = arith.constant 0 : index
    %112 = vector.load %arg21[%c0_82, %c0_83] : memref<16x16xbf16, #tpu.memory_space<vmem>>, vector<16x16xbf16>
    %113 = arith.truncf %111 : vector<8x16xf32> to vector<8x16xbf16>
    %cst_84 = arith.constant dense<0.000000e+00> : vector<8x16xf32>
    %114 = tpu.matmul %113, %112, %cst_84 {dimension_numbers = #tpu.dot_dimension_numbers<[1], [0], [0], [1], [0, 0, 1, 1], [], []>} : vector<8x16xbf16>, vector<16x16xbf16>, vector<8x16xf32> -> vector<8x16xf32>
    %c0_85 = arith.constant 0 : index
    %c0_86 = arith.constant 0 : index
    %115 = vector.load %arg17[%c0_85, %c0_86] : memref<1x16xf32, #tpu.memory_space<vmem>>, vector<1x16xf32>
    %116 = vector.broadcast %115 : vector<1x16xf32> to vector<8x16xf32>
    %117 = arith.mulf %114, %116 : vector<8x16xf32>
    %c0_87 = arith.constant 0 : index
    %c0_88 = arith.constant 0 : index
    %118 = vector.load %arg13[%c0_87, %c0_88] : memref<1x16xf32, #tpu.memory_space<vmem>>, vector<1x16xf32>
    %119 = vector.broadcast %118 : vector<1x16xf32> to vector<8x16xf32>
    %120 = arith.addf %117, %119 : vector<8x16xf32>
    %cst_89 = arith.constant 0.000000e+00 : f32
    %121 = vector.broadcast %cst_89 : f32 to vector<8x16xf32>
    %122 = arith.maximumf %120, %121 : vector<8x16xf32>
    %123 = arith.addf %80, %122 : vector<8x16xf32>
    %124 = arith.truncf %123 : vector<8x16xf32> to vector<8x16xbf16>
    %cst_90 = arith.constant dense<0.000000e+00> : vector<8x48xf32>
    %125 = tpu.matmul %124, %0, %cst_90 {dimension_numbers = #tpu.dot_dimension_numbers<[1], [0], [0], [1], [0, 0, 1, 1], [], []>} : vector<8x16xbf16>, vector<16x48xbf16>, vector<8x48xf32> -> vector<8x48xf32>
    %126 = vector.broadcast %1 : vector<1x48xf32> to vector<8x48xf32>
    %127 = arith.addf %125, %126 : vector<8x48xf32>
    %128 = vector.extract_strided_slice %127 {offsets = [0, 0], sizes = [1, 48], strides = [1, 1]} : vector<8x48xf32> to vector<1x48xf32>
    %c0_91 = arith.constant 0 : index
    %c0_92 = arith.constant 0 : index
    %c0_93 = arith.constant 0 : index
    %129 = vector.load %arg40[%c0_91, %c0_92, %c0_93] : memref<1x1x48xf32, #tpu.memory_space<vmem>>, vector<1x1x48xf32>
    %130 = vector.shape_cast %129 : vector<1x1x48xf32> to vector<1x48xf32>
    %131 = vector.shape_cast %128 : vector<1x48xf32> to vector<1x1x48xf32>
    tpu.vector_store %arg40[%c0_91, %c0_92, %c0_93], %131 {strides = array<i32>} : memref<1x1x48xf32, #tpu.memory_space<vmem>>, vector<1x1x48xf32>,
    %c0_94 = arith.constant 0 : index
    %c0_95 = arith.constant 0 : index
    %132 = vector.load %arg32[%c0_94, %c0_95] : memref<8x8xf32, #tpu.memory_space<vmem>>, vector<8x8xf32>
    %133 = arith.truncf %132 : vector<8x8xf32> to vector<8x8xbf16>
    %134 = arith.truncf %65 : vector<8x32xf32> to vector<8x32xbf16>
    %cst_96 = arith.constant dense<0.000000e+00> : vector<8x32xf32>
    %135 = tpu.matmul %133, %134, %cst_96 {dimension_numbers = #tpu.dot_dimension_numbers<[1], [0], [0], [1], [0, 0, 1, 1], [], []>} : vector<8x8xbf16>, vector<8x32xbf16>, vector<8x32xf32> -> vector<8x32xf32>
    %c0_97 = arith.constant 0 : index
    %c0_98 = arith.constant 0 : index
    %136 = vector.load %arg23[%c0_97, %c0_98] : memref<32x32xbf16, #tpu.memory_space<vmem>>, vector<32x32xbf16>
    %137 = arith.truncf %135 : vector<8x32xf32> to vector<8x32xbf16>
    %cst_99 = arith.constant dense<0.000000e+00> : vector<8x32xf32>
    %138 = tpu.matmul %137, %136, %cst_99 {dimension_numbers = #tpu.dot_dimension_numbers<[1], [0], [0], [1], [0, 0, 1, 1], [], []>} : vector<8x32xbf16>, vector<32x32xbf16>, vector<8x32xf32> -> vector<8x32xf32>
    %c0_100 = arith.constant 0 : index
    %c0_101 = arith.constant 0 : index
    %139 = vector.load %arg33[%c0_100, %c0_101] : memref<8x8xf32, #tpu.memory_space<vmem>>, vector<8x8xf32>
    %140 = arith.truncf %139 : vector<8x8xf32> to vector<8x8xbf16>
    %141 = arith.truncf %65 : vector<8x32xf32> to vector<8x32xbf16>
    %cst_102 = arith.constant dense<0.000000e+00> : vector<8x32xf32>
    %142 = tpu.matmul %140, %141, %cst_102 {dimension_numbers = #tpu.dot_dimension_numbers<[1], [0], [0], [1], [0, 0, 1, 1], [], []>} : vector<8x8xbf16>, vector<8x32xbf16>, vector<8x32xf32> -> vector<8x32xf32>
    %c0_103 = arith.constant 0 : index
    %c0_104 = arith.constant 0 : index
    %143 = vector.load %arg24[%c0_103, %c0_104] : memref<32x32xbf16, #tpu.memory_space<vmem>>, vector<32x32xbf16>
    %144 = arith.truncf %142 : vector<8x32xf32> to vector<8x32xbf16>
    %cst_105 = arith.constant dense<0.000000e+00> : vector<8x32xf32>
    %145 = tpu.matmul %144, %143, %cst_105 {dimension_numbers = #tpu.dot_dimension_numbers<[1], [0], [0], [1], [0, 0, 1, 1], [], []>} : vector<8x32xbf16>, vector<32x32xbf16>, vector<8x32xf32> -> vector<8x32xf32>
    %146 = arith.addf %138, %145 : vector<8x32xf32>
    %c0_106 = arith.constant 0 : index
    %c0_107 = arith.constant 0 : index
    %147 = vector.load %arg34[%c0_106, %c0_107] : memref<8x8xf32, #tpu.memory_space<vmem>>, vector<8x8xf32>
    %148 = arith.truncf %147 : vector<8x8xf32> to vector<8x8xbf16>
    %149 = arith.truncf %65 : vector<8x32xf32> to vector<8x32xbf16>
    %cst_108 = arith.constant dense<0.000000e+00> : vector<8x32xf32>
    %150 = tpu.matmul %148, %149, %cst_108 {dimension_numbers = #tpu.dot_dimension_numbers<[1], [0], [0], [1], [0, 0, 1, 1], [], []>} : vector<8x8xbf16>, vector<8x32xbf16>, vector<8x32xf32> -> vector<8x32xf32>
    %c0_109 = arith.constant 0 : index
    %c0_110 = arith.constant 0 : index
    %151 = vector.load %arg25[%c0_109, %c0_110] : memref<32x32xbf16, #tpu.memory_space<vmem>>, vector<32x32xbf16>
    %152 = arith.truncf %150 : vector<8x32xf32> to vector<8x32xbf16>
    %cst_111 = arith.constant dense<0.000000e+00> : vector<8x32xf32>
    %153 = tpu.matmul %152, %151, %cst_111 {dimension_numbers = #tpu.dot_dimension_numbers<[1], [0], [0], [1], [0, 0, 1, 1], [], []>} : vector<8x32xbf16>, vector<32x32xbf16>, vector<8x32xf32> -> vector<8x32xf32>
    %154 = arith.addf %146, %153 : vector<8x32xf32>
    %c0_112 = arith.constant 0 : index
    %c0_113 = arith.constant 0 : index
    %155 = vector.load %arg18[%c0_112, %c0_113] : memref<1x32xf32, #tpu.memory_space<vmem>>, vector<1x32xf32>
    %156 = vector.broadcast %155 : vector<1x32xf32> to vector<8x32xf32>
    %157 = arith.mulf %154, %156 : vector<8x32xf32>
    %c0_114 = arith.constant 0 : index
    %c0_115 = arith.constant 0 : index
    %158 = vector.load %arg14[%c0_114, %c0_115] : memref<1x32xf32, #tpu.memory_space<vmem>>, vector<1x32xf32>
    %159 = vector.broadcast %158 : vector<1x32xf32> to vector<8x32xf32>
    %160 = arith.addf %157, %159 : vector<8x32xf32>
    %cst_116 = arith.constant 0.000000e+00 : f32
    %161 = vector.broadcast %cst_116 : f32 to vector<8x32xf32>
    %162 = arith.maximumf %160, %161 : vector<8x32xf32>
    %c0_117 = arith.constant 0 : index
    %c0_118 = arith.constant 0 : index
    %163 = vector.load %arg22[%c0_117, %c0_118] : memref<32x32xbf16, #tpu.memory_space<vmem>>, vector<32x32xbf16>
    %164 = arith.truncf %162 : vector<8x32xf32> to vector<8x32xbf16>
    %cst_119 = arith.constant dense<0.000000e+00> : vector<8x32xf32>
    %165 = tpu.matmul %164, %163, %cst_119 {dimension_numbers = #tpu.dot_dimension_numbers<[1], [0], [0], [1], [0, 0, 1, 1], [], []>} : vector<8x32xbf16>, vector<32x32xbf16>, vector<8x32xf32> -> vector<8x32xf32>
    %c0_120 = arith.constant 0 : index
    %c0_121 = arith.constant 0 : index
    %166 = vector.load %arg20[%c0_120, %c0_121] : memref<16x32xbf16, #tpu.memory_space<vmem>>, vector<16x32xbf16>
    %167 = arith.truncf %123 : vector<8x16xf32> to vector<8x16xbf16>
    %cst_122 = arith.constant dense<0.000000e+00> : vector<8x32xf32>
    %168 = tpu.matmul %167, %166, %cst_122 {dimension_numbers = #tpu.dot_dimension_numbers<[1], [0], [0], [1], [0, 0, 1, 1], [], []>} : vector<8x16xbf16>, vector<16x32xbf16>, vector<8x32xf32> -> vector<8x32xf32>
    %169 = arith.addf %165, %168 : vector<8x32xf32>
    %c0_123 = arith.constant 0 : index
    %c0_124 = arith.constant 0 : index
    %170 = vector.load %arg16[%c0_123, %c0_124] : memref<1x32xf32, #tpu.memory_space<vmem>>, vector<1x32xf32>
    %171 = vector.broadcast %170 : vector<1x32xf32> to vector<8x32xf32>
    %172 = arith.mulf %169, %171 : vector<8x32xf32>
    %c0_125 = arith.constant 0 : index
    %c0_126 = arith.constant 0 : index
    %173 = vector.load %arg12[%c0_125, %c0_126] : memref<1x32xf32, #tpu.memory_space<vmem>>, vector<1x32xf32>
    %174 = vector.broadcast %173 : vector<1x32xf32> to vector<8x32xf32>
    %175 = arith.addf %172, %174 : vector<8x32xf32>
    %cst_127 = arith.constant 0.000000e+00 : f32
    %176 = vector.broadcast %cst_127 : f32 to vector<8x32xf32>
    %177 = arith.maximumf %175, %176 : vector<8x32xf32>
    %178 = arith.addf %77, %177 : vector<8x32xf32>
    %c0_128 = arith.constant 0 : index
    %c0_129 = arith.constant 0 : index
    %179 = vector.load %arg36[%c0_128, %c0_129] : memref<32x51xbf16, #tpu.memory_space<vmem>>, vector<32x51xbf16>
    %180 = arith.truncf %178 : vector<8x32xf32> to vector<8x32xbf16>
    %cst_130 = arith.constant dense<0.000000e+00> : vector<8x51xf32>
    %181 = tpu.matmul %180, %179, %cst_130 {dimension_numbers = #tpu.dot_dimension_numbers<[1], [0], [0], [1], [0, 0, 1, 1], [], []>} : vector<8x32xbf16>, vector<32x51xbf16>, vector<8x51xf32> -> vector<8x51xf32>
    %c0_131 = arith.constant 0 : index
    %c0_132 = arith.constant 0 : index
    %182 = vector.load %arg35[%c0_131, %c0_132] : memref<1x51xf32, #tpu.memory_space<vmem>>, vector<1x51xf32>
    %183 = vector.broadcast %182 : vector<1x51xf32> to vector<8x51xf32>
    %184 = arith.addf %181, %183 : vector<8x51xf32>
    %185 = vector.extract_strided_slice %184 {offsets = [0, 0], sizes = [1, 51], strides = [1, 1]} : vector<8x51xf32> to vector<1x51xf32>
    %c0_133 = arith.constant 0 : index
    %c0_134 = arith.constant 0 : index
    %c0_135 = arith.constant 0 : index
    %186 = vector.load %arg41[%c0_133, %c0_134, %c0_135] : memref<1x1x51xf32, #tpu.memory_space<vmem>>, vector<1x1x51xf32>
    %187 = vector.shape_cast %186 : vector<1x1x51xf32> to vector<1x51xf32>
    %188 = vector.shape_cast %185 : vector<1x51xf32> to vector<1x1x51xf32>
    tpu.vector_store %arg41[%c0_133, %c0_134, %c0_135], %188 {strides = array<i32>} : memref<1x1x51xf32, #tpu.memory_space<vmem>>, vector<1x1x51xf32>,
    return
  }
  func.func @transform_0(%arg0: i32) -> (i32, i32, i32) {
    %c0_i32 = arith.constant 0 : i32
    %c0_i32_0 = arith.constant 0 : i32
    %c0_i32_1 = arith.constant 0 : i32
    return %arg0, %c0_i32, %c0_i32_0 : i32, i32, i32
  }
  func.func @transform_1(%arg0: i32) -> (i32, i32) {
    %c0_i32 = arith.constant 0 : i32
    %c0_i32_0 = arith.constant 0 : i32
    %c0_i32_1 = arith.constant 0 : i32
    return %c0_i32, %c0_i32_0 : i32, i32
  }
  func.func @transform_2(%arg0: i32) -> (i32, i32) {
    %c0_i32 = arith.constant 0 : i32
    %c0_i32_0 = arith.constant 0 : i32
    %c0_i32_1 = arith.constant 0 : i32
    return %c0_i32, %c0_i32_0 : i32, i32
  }
  func.func @transform_3(%arg0: i32) -> (i32, i32) {
    %c0_i32 = arith.constant 0 : i32
    %c0_i32_0 = arith.constant 0 : i32
    %c0_i32_1 = arith.constant 0 : i32
    return %c0_i32, %c0_i32_0 : i32, i32
  }
  func.func @transform_4(%arg0: i32) -> (i32, i32) {
    %c0_i32 = arith.constant 0 : i32
    %c0_i32_0 = arith.constant 0 : i32
    %c0_i32_1 = arith.constant 0 : i32
    return %c0_i32, %c0_i32_0 : i32, i32
  }
  func.func @transform_5(%arg0: i32) -> (i32, i32) {
    %c0_i32 = arith.constant 0 : i32
    %c0_i32_0 = arith.constant 0 : i32
    %c0_i32_1 = arith.constant 0 : i32
    return %c0_i32, %c0_i32_0 : i32, i32
  }
  func.func @transform_6(%arg0: i32) -> (i32, i32) {
    %c0_i32 = arith.constant 0 : i32
    %c0_i32_0 = arith.constant 0 : i32
    %c0_i32_1 = arith.constant 0 : i32
    return %c0_i32, %c0_i32_0 : i32, i32
  }
  func.func @transform_7(%arg0: i32) -> (i32, i32) {
    %c0_i32 = arith.constant 0 : i32
    %c0_i32_0 = arith.constant 0 : i32
    %c0_i32_1 = arith.constant 0 : i32
    return %c0_i32, %c0_i32_0 : i32, i32
  }
  func.func @transform_8(%arg0: i32) -> (i32, i32) {
    %c0_i32 = arith.constant 0 : i32
    %c0_i32_0 = arith.constant 0 : i32
    %c0_i32_1 = arith.constant 0 : i32
    return %c0_i32, %c0_i32_0 : i32, i32
  }
  func.func @transform_9(%arg0: i32) -> (i32, i32) {
    %c0_i32 = arith.constant 0 : i32
    %c0_i32_0 = arith.constant 0 : i32
    %c0_i32_1 = arith.constant 0 : i32
    return %c0_i32, %c0_i32_0 : i32, i32
  }
  func.func @transform_10(%arg0: i32) -> (i32, i32) {
    %c0_i32 = arith.constant 0 : i32
    %c0_i32_0 = arith.constant 0 : i32
    %c0_i32_1 = arith.constant 0 : i32
    return %c0_i32, %c0_i32_0 : i32, i32
  }
  func.func @transform_11(%arg0: i32) -> (i32, i32) {
    %c0_i32 = arith.constant 0 : i32
    %c0_i32_0 = arith.constant 0 : i32
    %c0_i32_1 = arith.constant 0 : i32
    return %c0_i32, %c0_i32_0 : i32, i32
  }
  func.func @transform_12(%arg0: i32) -> (i32, i32) {
    %c0_i32 = arith.constant 0 : i32
    %c0_i32_0 = arith.constant 0 : i32
    %c0_i32_1 = arith.constant 0 : i32
    return %c0_i32, %c0_i32_0 : i32, i32
  }
  func.func @transform_13(%arg0: i32) -> (i32, i32) {
    %c0_i32 = arith.constant 0 : i32
    %c0_i32_0 = arith.constant 0 : i32
    %c0_i32_1 = arith.constant 0 : i32
    return %c0_i32, %c0_i32_0 : i32, i32
  }
  func.func @transform_14(%arg0: i32) -> (i32, i32) {
    %c0_i32 = arith.constant 0 : i32
    %c0_i32_0 = arith.constant 0 : i32
    %c0_i32_1 = arith.constant 0 : i32
    return %c0_i32, %c0_i32_0 : i32, i32
  }
  func.func @transform_15(%arg0: i32) -> (i32, i32) {
    %c0_i32 = arith.constant 0 : i32
    %c0_i32_0 = arith.constant 0 : i32
    %c0_i32_1 = arith.constant 0 : i32
    return %c0_i32, %c0_i32_0 : i32, i32
  }
  func.func @transform_16(%arg0: i32) -> (i32, i32) {
    %c0_i32 = arith.constant 0 : i32
    %c0_i32_0 = arith.constant 0 : i32
    %c0_i32_1 = arith.constant 0 : i32
    return %c0_i32, %c0_i32_0 : i32, i32
  }
  func.func @transform_17(%arg0: i32) -> (i32, i32) {
    %c0_i32 = arith.constant 0 : i32
    %c0_i32_0 = arith.constant 0 : i32
    %c0_i32_1 = arith.constant 0 : i32
    return %c0_i32, %c0_i32_0 : i32, i32
  }
  func.func @transform_18(%arg0: i32) -> (i32, i32) {
    %c0_i32 = arith.constant 0 : i32
    %c0_i32_0 = arith.constant 0 : i32
    %c0_i32_1 = arith.constant 0 : i32
    return %c0_i32, %c0_i32_0 : i32, i32
  }
  func.func @transform_19(%arg0: i32) -> (i32, i32) {
    %c0_i32 = arith.constant 0 : i32
    %c0_i32_0 = arith.constant 0 : i32
    %c0_i32_1 = arith.constant 0 : i32
    return %c0_i32, %c0_i32_0 : i32, i32
  }
  func.func @transform_20(%arg0: i32) -> (i32, i32) {
    %c0_i32 = arith.constant 0 : i32
    %c0_i32_0 = arith.constant 0 : i32
    %c0_i32_1 = arith.constant 0 : i32
    return %c0_i32, %c0_i32_0 : i32, i32
  }
  func.func @transform_21(%arg0: i32) -> (i32, i32) {
    %c0_i32 = arith.constant 0 : i32
    %c0_i32_0 = arith.constant 0 : i32
    %c0_i32_1 = arith.constant 0 : i32
    return %c0_i32, %c0_i32_0 : i32, i32
  }
  func.func @transform_22(%arg0: i32) -> (i32, i32) {
    %c0_i32 = arith.constant 0 : i32
    %c0_i32_0 = arith.constant 0 : i32
    %c0_i32_1 = arith.constant 0 : i32
    return %c0_i32, %c0_i32_0 : i32, i32
  }
  func.func @transform_23(%arg0: i32) -> (i32, i32) {
    %c0_i32 = arith.constant 0 : i32
    %c0_i32_0 = arith.constant 0 : i32
    %c0_i32_1 = arith.constant 0 : i32
    return %c0_i32, %c0_i32_0 : i32, i32
  }
  func.func @transform_24(%arg0: i32) -> (i32, i32) {
    %c0_i32 = arith.constant 0 : i32
    %c0_i32_0 = arith.constant 0 : i32
    %c0_i32_1 = arith.constant 0 : i32
    return %c0_i32, %c0_i32_0 : i32, i32
  }
  func.func @transform_25(%arg0: i32) -> (i32, i32) {
    %c0_i32 = arith.constant 0 : i32
    %c0_i32_0 = arith.constant 0 : i32
    %c0_i32_1 = arith.constant 0 : i32
    return %c0_i32, %c0_i32_0 : i32, i32
  }
  func.func @transform_26(%arg0: i32) -> (i32, i32) {
    %c0_i32 = arith.constant 0 : i32
    %c0_i32_0 = arith.constant 0 : i32
    %c0_i32_1 = arith.constant 0 : i32
    return %c0_i32, %c0_i32_0 : i32, i32
  }
  func.func @transform_27(%arg0: i32) -> (i32, i32) {
    %c0_i32 = arith.constant 0 : i32
    %c0_i32_0 = arith.constant 0 : i32
    %c0_i32_1 = arith.constant 0 : i32
    return %c0_i32, %c0_i32_0 : i32, i32
  }
  func.func @transform_28(%arg0: i32) -> (i32, i32) {
    %c0_i32 = arith.constant 0 : i32
    %c0_i32_0 = arith.constant 0 : i32
    %c0_i32_1 = arith.constant 0 : i32
    return %c0_i32, %c0_i32_0 : i32, i32
  }
  func.func @transform_29(%arg0: i32) -> (i32, i32) {
    %c0_i32 = arith.constant 0 : i32
    %c0_i32_0 = arith.constant 0 : i32
    %c0_i32_1 = arith.constant 0 : i32
    return %c0_i32, %c0_i32_0 : i32, i32
  }
  func.func @transform_30(%arg0: i32) -> (i32, i32) {
    %c0_i32 = arith.constant 0 : i32
    %c0_i32_0 = arith.constant 0 : i32
    %c0_i32_1 = arith.constant 0 : i32
    return %c0_i32, %c0_i32_0 : i32, i32
  }
  func.func @transform_31(%arg0: i32) -> (i32, i32) {
    %c0_i32 = arith.constant 0 : i32
    %c0_i32_0 = arith.constant 0 : i32
    %c0_i32_1 = arith.constant 0 : i32
    return %c0_i32, %c0_i32_0 : i32, i32
  }
  func.func @transform_32(%arg0: i32) -> (i32, i32) {
    %c0_i32 = arith.constant 0 : i32
    %c0_i32_0 = arith.constant 0 : i32
    %c0_i32_1 = arith.constant 0 : i32
    return %c0_i32, %c0_i32_0 : i32, i32
  }
  func.func @transform_33(%arg0: i32) -> (i32, i32) {
    %c0_i32 = arith.constant 0 : i32
    %c0_i32_0 = arith.constant 0 : i32
    %c0_i32_1 = arith.constant 0 : i32
    return %c0_i32, %c0_i32_0 : i32, i32
  }
  func.func @transform_34(%arg0: i32) -> (i32, i32) {
    %c0_i32 = arith.constant 0 : i32
    %c0_i32_0 = arith.constant 0 : i32
    %c0_i32_1 = arith.constant 0 : i32
    return %c0_i32, %c0_i32_0 : i32, i32
  }
  func.func @transform_35(%arg0: i32) -> (i32, i32) {
    %c0_i32 = arith.constant 0 : i32
    %c0_i32_0 = arith.constant 0 : i32
    %c0_i32_1 = arith.constant 0 : i32
    return %c0_i32, %c0_i32_0 : i32, i32
  }
  func.func @transform_36(%arg0: i32) -> (i32, i32) {
    %c0_i32 = arith.constant 0 : i32
    %c0_i32_0 = arith.constant 0 : i32
    %c0_i32_1 = arith.constant 0 : i32
    return %c0_i32, %c0_i32_0 : i32, i32
  }
  func.func @transform_37(%arg0: i32) -> (i32, i32) {
    %c0_i32 = arith.constant 0 : i32
    %c0_i32_0 = arith.constant 0 : i32
    %c0_i32_1 = arith.constant 0 : i32
    return %c0_i32, %c0_i32_0 : i32, i32
  }
  func.func @transform_38(%arg0: i32) -> (i32, i32, i32) {
    %c0_i32 = arith.constant 0 : i32
    %c0_i32_0 = arith.constant 0 : i32
    %c0_i32_1 = arith.constant 0 : i32
    return %arg0, %c0_i32, %c0_i32_0 : i32, i32, i32
  }
  func.func @transform_39(%arg0: i32) -> (i32, i32, i32) {
    %c0_i32 = arith.constant 0 : i32
    %c0_i32_0 = arith.constant 0 : i32
    %c0_i32_1 = arith.constant 0 : i32
    return %arg0, %c0_i32, %c0_i32_0 : i32, i32, i32
  }
  func.func @transform_40(%arg0: i32) -> (i32, i32, i32) {
    %c0_i32 = arith.constant 0 : i32
    %c0_i32_0 = arith.constant 0 : i32
    %c0_i32_1 = arith.constant 0 : i32
    return %arg0, %c0_i32, %c0_i32_0 : i32, i32, i32
  }
}

</mosaic_0001>

<bundles_post_ra>
// kernel: _forward_impl.1
= control target key start
LH: loop header
LB: loop body
LE: loop exit
PB: predicated region body
PF: predicated region fallthrough
CT: control target
= control target key end

     0   :  { %s2912_s6 = smov 1   ;;  %s2913_s10 = smov 2   ;;  %s3306_s0 = inlined_call_operand.smem [shape: u32[41], index: -1, kind: input, shape index: {}] }
   0x1   :  { %s2961_s5 = sld [smem:[%s3306_s0]]   ;;  %s2914_s14 = smov 3  }
   0x2   :  { %s2966_s9 = sld [smem:[%s3306_s0 + %s2912_s6]]   ;;  %s2915_s18 = smov 4  }
   0x3   :  { %s2971_s13 = sld [smem:[%s3306_s0 + %s2913_s10]]   ;;  %s2916_s22 = smov 5  }
   0x4   :  { %s2976_s17 = sld [smem:[%s3306_s0 + %s2914_s14]]   ;;  %s2917_s26 = smov 6  }
   0x5   :  { %s2981_s21 = sld [smem:[%s3306_s0 + %s2915_s18]]   ;;  %s2918_s30 = smov 7  }
   0x6   :  { %s2986_s25 = sld [smem:[%s3306_s0 + %s2916_s22]]   ;;  %s2919_s4 = smov 8  }
   0x7   :  { %s2991_s29 = sld [smem:[%s3306_s0 + %s2917_s26]]   ;;  %s2920_s10 = smov 9  }
   0x8   :  { %3312 = sst [smem:[#allocation2_spill]] %s2966_s9  ;;  %s2921_s15 = smov 10  }
   0x9   :  { %s2996_s3 = sld [smem:[%s3306_s0 + %s2918_s30]]   ;;  %s2922_s20 = smov 11  }
   0xa   :  { %s3001_s8 = sld [smem:[%s3306_s0 + %s2919_s4]]   ;;  %s2923_s26 = smov 12  }
   0xb   :  { %s3006_s14 = sld [smem:[%s3306_s0 + %s2920_s10]]   ;;  %s2924_s1 = smov 13  }
   0xc   :  { %s3011_s19 = sld [smem:[%s3306_s0 + %s2921_s15]]   ;;  %s2925_s7 = smov 14  }
   0xd   :  { %s3016_s24 = sld [smem:[%s3306_s0 + %s2922_s20]]   ;;  %s2926_s15 = smov 15  }
   0xe   :  { %s3021_s30 = sld [smem:[%s3306_s0 + %s2923_s26]]   ;;  %s2927_s22 = smov 16  }
   0xf   :  { %s3026_s6 = sld [smem:[%s3306_s0 + %s2924_s1]]   ;;  %s2928_s28 = smov 17  }
  0x10   :  { %s3031_s12 = sld [smem:[%s3306_s0 + %s2925_s7]]   ;;  %s2929_s7 = smov 18  }
  0x11   :  { %s3036_s20 = sld [smem:[%s3306_s0 + %s2926_s15]]   ;;  %s2930_s15 = smov 19  }
  0x12   :  { %s3041_s27 = sld [smem:[%s3306_s0 + %s2927_s22]]   ;;  %s2931_s22 = smov 20  }
  0x13   :  { %3313 = sst [smem:[#allocation3_spill]] %s3016_s24 }
  0x14   :  { %3314 = sst [smem:[#allocation4_spill]] %s3021_s30 }
  0x15   :  { %3315 = sst [smem:[#allocation5_spill]] %s3026_s6 }
  0x16   :  { %3316 = sst [smem:[#allocation6_spill]] %s3031_s12 }
  0x17   :  { %3317 = sst [smem:[#allocation7_spill]] %s3036_s20 }
  0x18   :  { %3318 = sst [smem:[#allocation8_spill]] %s3041_s27 }
  0x19   :  { %s3046_s4 = sld [smem:[%s3306_s0 + %s2928_s28]]   ;;  %s2932_s28 = smov 21  }
  0x1a   :  { %s3051_s24 = sld [smem:[%s3306_s0 + %s2929_s7]]   ;;  %s2933_s7 = smov 22  }
  0x1b   :  { %s3056_s20 = sld [smem:[%s3306_s0 + %s2930_s15]]   ;;  %s2934_s15 = smov 23  }
  0x1c   :  { %s3061_s6 = sld [smem:[%s3306_s0 + %s2931_s22]]   ;;  %s2935_s22 = smov 24  }
  0x1d   :  { %s3071_s30 = sld [smem:[%s3306_s0 + %s2933_s7]]   ;;  %s2937_s7 = smov 26  }
  0x1e   :  { %s3076_s27 = sld [smem:[%s3306_s0 + %s2934_s15]]   ;;  %s2938_s15 = smov 27  }
  0x1f   :  { %3319 = sst [smem:[#allocation9_spill]] %s3046_s4 }
  0x20   :  { %3320 = sst [smem:[#allocation10_spill]] %s3051_s24 }
  0x21   :  { %3321 = sst [smem:[#allocation11_spill]] %s3056_s20 }
  0x22   :  { %3322 = sst [smem:[#allocation12_spill]] %s3061_s6 }
  0x23   :  { %s3066_s4 = sld [smem:[%s3306_s0 + %s2932_s28]]   ;;  %s2936_s28 = smov 25  }
  0x24   :  { %3324 = sst [smem:[#allocation14_spill]] %s3071_s30 }
  0x25   :  { %3325 = sst [smem:[#allocation15_spill]] %s3076_s27 }
  0x26   :  { %s3081_s20 = sld [smem:[%s3306_s0 + %s2935_s22]]   ;;  %s2939_s22 = smov 28  }
  0x27   :  { %s3091_s30 = sld [smem:[%s3306_s0 + %s2937_s7]]   ;;  %s2941_s7 = smov 30  }
  0x28   :  { %s3096_s27 = sld [smem:[%s3306_s0 + %s2938_s15]]   ;;  %s2942_s15 = smov 31  }
  0x29   :  { %3323 = sst [smem:[#allocation13_spill]] %s3066_s4 }
  0x2a   :  { %s3086_s4 = sld [smem:[%s3306_s0 + %s2936_s28]]   ;;  %s2940_s28 = smov 29  }
  0x2b   :  { %s3106_s12 = sld [smem:[%s3306_s0 + %s2940_s28]]   ;;  %s2944_s28 = smov 33  }
  0x2c   :  { %3326 = sst [smem:[#allocation16_spill]] %s3081_s20 }
  0x2d   :  { %3327 = sst [smem:[#allocation17_spill]] %s3091_s30 }
  0x2e   :  { %3328 = sst [smem:[#allocation18_spill]] %s3096_s27 }
  0x2f   :  { %s3101_s20 = sld [smem:[%s3306_s0 + %s2939_s22]]   ;;  %s2943_s22 = smov 32  }
  0x30   :  { %s3111_s24 = sld [smem:[%s3306_s0 + %s2941_s7]]   ;;  %s2945_s7 = smov 34  }
  0x31   :  { %s3116_s6 = sld [smem:[%s3306_s0 + %s2942_s15]]   ;;  %s2946_s15 = smov 35  }
  0x32   :  { %s3121_s30 = sld [smem:[%s3306_s0 + %s2943_s22]]   ;;  %s2947_s22 = smov 36  }
  0x33   :  { %s3126_s9 = sld [smem:[%s3306_s0 + %s2944_s28]]   ;;  %s2948_s28 = smov 37  }
  0x34   :  { %s3131_s27 = sld [smem:[%s3306_s0 + %s2945_s7]]   ;;  %s2949_s7 = smov 38  }
  0x37   :  { %3329 = sst [smem:[#allocation19_spill]] %s3116_s6 }
  0x38   :  { %3330 = sst [smem:[#allocation20_spill]] %s3121_s30 }
  0x39   :  { %3331 = sst [smem:[#allocation21_spill]] %s3126_s9 }
  0x3a   :  { %3332 = sst [smem:[#allocation22_spill]] %s3131_s27 }
  0x3b   :  { %s3136_s6 = sld [smem:[%s3306_s0 + %s2946_s15]]   ;;  %s2950_s15 = smov 39  }
  0x3c   :  { %s3141_s30 = sld [smem:[%s3306_s0 + %s2947_s22]]   ;;  %s2951_s22 = smov 40  }
  0x3d   :  { %s3146_s9 = sld [smem:[%s3306_s0 + %s2948_s28]]   ;;  %s3163_s28 = smov 0  }
  0x3e   :  { %s3151_s27 = sld [smem:[%s3306_s0 + %s2949_s7]]  }
  0x41   :  { %3333 = sst [smem:[#allocation23_spill]] %s3136_s6 }
  0x42   :  { %3334 = sst [smem:[#allocation24_spill]] %s3141_s30 }
  0x43   :  { %s3156_s6 = sld [smem:[%s3306_s0 + %s2950_s15]]  }
  0x44   :  { %s3161_s30 = sld [smem:[%s3306_s0 + %s2951_s22]]  }
  0x45 LB: > { %s2481_s1 = sadd.s32 4294967295, %s2910_s28   ;;  %p2485_p0 = scmp.ge.s32.totalorder %s2910_s28, 1  ;;  %s2910_s28 = sphi %s3163_s28, %s92_s28  }
  0x46   : > { %p1108_p1 = scmp.lt.s32.totalorder %s2910_s28, 3 }
  0x48   : > { %p1109_p2 = pnand %p2485_p0, %p1108_p1 }
  0x49   : > { %p1211_p3 = scmp.lt.s32.totalorder (!%p1109_p2), %s2481_s1, 1  ;;  %s3335_s7 = sld [smem:[#allocation19_spill]] (!%p1109_p2) }
  0x4a   : > { %1112 = sbr.rel (%p1109_p2) target bundleno = 1232 (0x4d0), region = 172  ;;  %s3336_s10 = sld [smem:[#allocation18_spill]] (!%p1109_p2) }
  0x4b   : > { %s3337_s11 = sld [smem:[#allocation2_spill]] (!%p1109_p2) }
  0x4c   : > { %s3338_s15 = sld [smem:[#allocation20_spill]] (!%p1109_p2) }
  0x4d   : > { %s3339_s16 = sld [smem:[#allocation21_spill]] (!%p1109_p2) }
  0x4e   : > { %s3340_s18 = sld [smem:[#allocation17_spill]] (!%p1109_p2) }
  0x4f   : > { %vm1239_vm0 = vcmask 1043456   ;;  %vm1362_vm1 = vcmask 1046528   ;;  %v2952_v0 = vmov 65535   ;;  %v2793_v2 = vld [vmem:[%s3006_s14 + $0x38] sm:$0xff]  ;;  %s3359_s1 = smov (!%p1211_p3, %s2481_s1), 1  ;;  %vm1363_vm2 = vcmask 1047552  }
  0x50   : > { %v1364_v1 = vsel %vm1362_vm1, 4294967295, %v2952_v0  ;;  %v2785_v3 = vld [vmem:[%s3001_s8 + $0x38] sm:$0xff]  ;;  %vm1240_vm3 = vcmask 1044480   ;;  %v1241_v4 = vsel %vm1239_vm0, 4294967295, %v2952_v0  ;;  %s2776_s0 = sshll.u32 %s3359_s1, 4  ;;  %v2792_v8 = vld [vmem:[%s3006_s14 + $0x30] sm:$0xff] }
  0x51   : > { %v3176_v5 = vsel %vm1363_vm2, %v1364_v1, 0  ;;  %s1215_s2 = scalar_lea.vmem %s2961_s5, %s2776_s0  ;;  %v1242_v11 = vsel %vm1240_vm3, %v1241_v4, 0  ;;  %v2784_v12 = vld [vmem:[%s3001_s8 + $0x30] sm:$0xff]  ;;  %v1232_v14 = vld [vmem:[%s3101_s20] sm:$0xff]  ;;  %v2817_v16 = vld [vmem:[%s2981_s21 + $0x38] sm:$0xff]  ;;  %vm1235_vm4 = vcmask 72704  }
  0x52   : > { %v1367_v6 = vand.u32 %v2793_v2, %v3176_v5  ;;  %v1433_v7 = vand.u32 %v2785_v3, %v3176_v5  ;;  %v1230_v9 = vld [vmem:[%s1215_s2] sm:$0xff]  ;;  %v1231_v10 = vld [vmem:[%s1215_s2 + $0x8] sm:$0x1]  ;;  %v2801_v18 = vld [vmem:[%s3011_s19 + $0x38] sm:$0xff]  ;;  %v1233_v19 = vpack.c.bf16 %v1232_v14, %v1232_v14  ;;  %v1641_v24 = vand.u32 %v2817_v16, %v3176_v5  ;;  %s3341_s22 = sld [smem:[#allocation12_spill]]  ;;  %s2488_s26 = sshll.u32 %s3359_s1, 2 }
  0x53   : > { %v1234_v13 = vpack.c.bf16 %v1231_v10, %v1230_v9  ;;  %v1276_v15 = vld [vmem:[%s3106_s12] sm:$0xff]  ;;  %v2791_v21 = vld [vmem:[%s3006_s14 + $0x28] sm:$0xff]  ;;  %v1534_v23 = vand.u32 %v2801_v18, %v3176_v5  ;;  %v2800_v25 = vld [vmem:[%s3011_s19 + $0x30] sm:$0xff]  ;;  %vm1358_vm5 = vcmask 1039360   ;;  %vm1820_vm6 = vcmask 130048   ;;  %s3342_s23 = sld [smem:[#allocation24_spill]]  ;;  %s1219_s0 = scalar_lea.vmem %s3151_s27, %s2488_s26 }
  0x54   : > { %1369 = vmatpush.bf16.msra.mxu2 %v1367_v6  ;;  %1435 = vmatpush.bf16.msra.mxu3 %v1433_v7  ;;  %v1277_v20 = vpack.c.bf16 %v1276_v15, %v1276_v15  ;;  %v2783_v22 = vld [vmem:[%s3001_s8 + $0x28] sm:$0xff]  ;;  %v2790_v26 = vld [vmem:[%s3006_s14 + $0x20] sm:$0xff]  ;;  %v2816_v28 = vld [vmem:[%s2981_s21 + $0x30] sm:$0xff]  ;;  %vm1844_vm7 = vcmask 64512   ;;  %vm1837_vm8 = vcmask 387072   ;;  %s3343_s2 = sld [smem:[#allocation10_spill]] }
  0x55   : > { %v1244_v17 = vand.u32 %v1242_v11, %v1234_v13  ;;  %v2782_v27 = vld [vmem:[%s3001_s8 + $0x20] sm:$0xff]  ;;  %v2799_v29 = vld [vmem:[%s3011_s19 + $0x28] sm:$0xff]  ;;  %v2789_v30 = vld [vmem:[%s3006_s14 + $0x18] sm:$0xff]  ;;  %vm2113_vm9 = vcmask 261120   ;;  %s3352_s26 = sld [smem:[#allocation9_spill]]  ;;  %vm2050_vm10 = vcmask 385024  }
  0x56   : > { %v2781_v31 = vld [vmem:[%s3001_s8 + $0x18] sm:$0xff]  ;;  %v2815_v32 = vld [vmem:[%s2981_s21 + $0x28] sm:$0xff]  ;;  %v1448_v33 = vld [vmem:[%s3111_s24] sm:$0xff]  ;;  %vm2336_vm11 = vcmask 409600  }
  0x57   : > { %1253 = vmatpush.bf16.msra.mxu0 %v1244_v17  ;;  %1288 = vmatpush.bf16.msra.mxu1 %v1244_v17  ;;  %v2788_v34 = vld [vmem:[%s3006_s14 + $0x10] sm:$0xff]  ;;  %v2814_v36 = vld [vmem:[%s2981_s21 + $0x20] sm:$0xff]  ;;  %v1449_v37 = vpack.c.bf16 %v1448_v33, %v1448_v33  ;;  %v2787_v38 = vld [vmem:[%s3006_s14 + $0x8] sm:$0xff] }
  0x58   : > { %1370 = vmatpush.bf16.msra.mxu2 %v2792_v8  ;;  %1436 = vmatpush.bf16.msra.mxu3 %v2784_v12  ;;  %v2780_v35 = vld [vmem:[%s3001_s8 + $0x10] sm:$0xff]  ;;  %v2779_v39 = vld [vmem:[%s3001_s8 + $0x8] sm:$0xff]  ;;  %v2813_v40 = vld [vmem:[%s2981_s21 + $0x18] sm:$0xff] }
  0x59   : > { %v2809_v41 = vld [vmem:[%s2976_s17 + $0x38] sm:$0xff]  ;;  %v2786_v43 = vld [vmem:[%s3006_s14] sm:$0xff]  ;;  %v2812_v47 = vld [vmem:[%s2981_s21 + $0x10] sm:$0xff] }
  0x5a   : > { %2489 = vmatmul.msk.bf16.vlgmr.msra.gmra.mxu0 %vm1235_vm4, %v1233_v19  ;;  %2490 = vmatmul.msk.bf16.vlgmr.msra.gmra.mxu1 %vm1235_vm4, %v1277_v20  ;;  %v2825_v42 = vld [vmem:[%s2986_s25 + $0x38] sm:$0xff]  ;;  %v2778_v44 = vld [vmem:[%s3001_s8] sm:$0xff]  ;;  %v1704_v45 = vand.u32 %v2809_v41, %v3176_v5  ;;  %v2808_v48 = vld [vmem:[%s2976_s17 + $0x30] sm:$0xff] }
  0x5b   : > { %1460 = vmatpush.bf16.msrb.mxu0 %v1244_v17  ;;  %1536 = vmatpush.bf16.msrb.mxu1 %v1534_v23  ;;  %v1783_v46 = vand.u32 %v2825_v42, %v3176_v5  ;;  %v2824_v49 = vld [vmem:[%s2986_s25 + $0x30] sm:$0xff]  ;;  %v2811_v50 = vld [vmem:[%s2981_s21 + $0x8] sm:$0xff]  ;;  %v2798_v53 = vld [vmem:[%s3011_s19 + $0x20] sm:$0xff] }
  0x5c   : > { %1371 = vmatpush.bf16.msra.mxu2 %v2791_v21  ;;  %1437 = vmatpush.bf16.msra.mxu3 %v2783_v22  ;;  %v2807_v51 = vld [vmem:[%s2976_s17 + $0x28] sm:$0xff]  ;;  %v2810_v54 = vld [vmem:[%s2981_s21] sm:$0xff]  ;;  %v2797_v57 = vld [vmem:[%s3011_s19 + $0x18] sm:$0xff] }
  0x5d   : > { %v2823_v52 = vld [vmem:[%s2986_s25 + $0x28] sm:$0xff]  ;;  %v2806_v55 = vld [vmem:[%s2976_s17 + $0x20] sm:$0xff]  ;;  %v2805_v58 = vld [vmem:[%s2976_s17 + $0x18] sm:$0xff] }
  0x5e   : > { %v2822_v56 = vld [vmem:[%s2986_s25 + $0x20] sm:$0xff]  ;;  %v2821_v59 = vld [vmem:[%s2986_s25 + $0x18] sm:$0xff]  ;;  %v2796_v60 = vld [vmem:[%s3011_s19 + $0x10] sm:$0xff] }
  0x5f   : > { %1643 = vmatpush.bf16.msra.mxu0 %v1641_v24  ;;  %1537 = vmatpush.bf16.msrb.mxu1 %v2800_v25  ;;  %v2804_v61 = vld [vmem:[%s2976_s17 + $0x10] sm:$0xff]  ;;  %v2795_v63 = vld [vmem:[%s3011_s19 + $0x8] sm:$0xff]  ;;  %v2794_v2 = vld [vmem:[%s3011_s19] sm:$0xff] }
  0x60   : > { %1372 = vmatpush.bf16.msra.mxu2 %v2790_v26  ;;  %1438 = vmatpush.bf16.msra.mxu3 %v2782_v27  ;;  %v2820_v62 = vld [vmem:[%s2986_s25 + $0x10] sm:$0xff]  ;;  %v2803_v0 = vld [vmem:[%s2976_s17 + $0x8] sm:$0xff]  ;;  %v2802_v3 = vld [vmem:[%s2976_s17] sm:$0xff] }
  0x61   : > { %v2819_v1 = vld [vmem:[%s2986_s25 + $0x8] sm:$0xff]  ;;  %v2818_v4 = vld [vmem:[%s2986_s25] sm:$0xff] }
  0x62   : > { %v2777_v14 = vld [vmem:[%s3146_s9] sm:$0xff] }
  0x63   : > { %1644 = vmatpush.bf16.msra.mxu0 %v2816_v28  ;;  %1538 = vmatpush.bf16.msrb.mxu1 %v2799_v29  ;;  %v2826_v15 = vld [vmem:[%s3086_s4] sm:$0xff] }
  0x64   : > { %1373 = vmatpush.bf16.msra.mxu2 %v2789_v30  ;;  %1439 = vmatpush.bf16.msra.mxu3 %v2781_v31  ;;  %v2890_v23 = vld [vmem:[%s2996_s3] ss:$0 sm:$0xff] }
  0x65   : > { %v2891_v26 = vld [vmem:[%s2991_s29] ss:$0 sm:$0xff] }
  0x66   : > { %v2892_v33 = vld [vmem:[%s2971_s13] ss:$0 sm:$0xff] }
  0x67   : > { %1645 = vmatpush.bf16.msra.mxu0 %v2815_v32  ;;  %1539 = vmatpush.bf16.msrb.mxu1 %v2798_v53  ;;  %v2827_v53 = vld [vmem:[%s3340_s18] sm:$0xff]  ;;  %s3349_s18 = sld [smem:[#allocation8_spill]] }
  0x68   : > { %1374 = vmatpush.bf16.msra.mxu2 %v2788_v34  ;;  %1440 = vmatpush.bf16.msra.mxu3 %v2780_v35  ;;  %v1842_v35 = vld [vmem:[%s3335_s7] sm:$0xff]  ;;  %s3344_s7 = sld [smem:[#allocation6_spill]] }
  0x69   : > { %v1843_v42 = vpack.c.bf16 %v1842_v35, %v1842_v35 }
  0x6a   : > { %2557 = vmatmul.msk.bf16.vlgmr.msrb.gmra.mxu0 %vm1235_vm4, %v1449_v37 }
  0x6b   : > { %1646 = vmatpush.bf16.msra.mxu0 %v2814_v36  ;;  %1540 = vmatpush.bf16.msrb.mxu1 %v2797_v57 }
  0x6c   : > { %1375 = vmatpush.bf16.msra.mxu2 %v2787_v38  ;;  %1441 = vmatpush.bf16.msra.mxu3 %v2779_v39  ;;  %v2828_v38 = vld [vmem:[%s3336_s10] sm:$0xff]  ;;  %s3345_s10 = sld [smem:[#allocation16_spill]] }
  0x6f   : > { %1647 = vmatpush.bf16.msra.mxu0 %v2813_v40  ;;  %1541 = vmatpush.bf16.msrb.mxu1 %v2796_v60  ;;  %v2893_v40 = vld [vmem:[%s3337_s11] ss:$0 sm:$0xff]  ;;  %s3346_s11 = sld [smem:[#allocation15_spill]] }
  0x70   : > { %1376 = vmatpush.bf16.msra.mxu2 %v2786_v43  ;;  %1442 = vmatpush.bf16.msra.mxu3 %v2778_v44 }
  0x73   : > { %1648 = vmatpush.bf16.msra.mxu0 %v2812_v47  ;;  %1542 = vmatpush.bf16.msrb.mxu1 %v2795_v63  ;;  %v1839_v47 = vld [vmem:[%s3338_s15] sm:$0xff]  ;;  %s3347_s15 = sld [smem:[#allocation14_spill]] }
  0x74   : > { %1706 = vmatpush.bf16.msrb.mxu2 %v1704_v45  ;;  %1785 = vmatpush.bf16.msrb.mxu3 %v1783_v46 }
  0x77   : > { %1649 = vmatpush.bf16.msra.mxu0 %v2811_v50  ;;  %1543 = vmatpush.bf16.msrb.mxu1 %v2794_v2  ;;  %v1929_v50 = vld [vmem:[%s3339_s16] sm:$0xff]  ;;  %s3348_s16 = sld [smem:[#allocation11_spill]] }
  0x78   : > { %1707 = vmatpush.bf16.msrb.mxu2 %v2808_v48  ;;  %1786 = vmatpush.bf16.msrb.mxu3 %v2824_v49  ;;  %v1840_v48 = vpack.c.bf16 %v1839_v47, %v1839_v47 }
  0x7b   : > { %1650 = vmatpush.bf16.msra.mxu0 %v2810_v54  ;;  %1831 = vmatpush.bf16.msra.mxu1 %v2777_v14  ;;  %v2829_v54 = vld [vmem:[%s3341_s22] sm:$0xff]  ;;  %s3350_s22 = sld [smem:[#allocation4_spill]] }
  0x7c   : > { %1708 = vmatpush.bf16.msrb.mxu2 %v2807_v51  ;;  %1787 = vmatpush.bf16.msrb.mxu3 %v2823_v52  ;;  %v1930_v52 = vpack.c.bf16 %v1929_v50, %v1929_v50 }
  0x80   : > { %1709 = vmatpush.bf16.msrb.mxu2 %v2806_v55  ;;  %1788 = vmatpush.bf16.msrb.mxu3 %v2822_v56  ;;  %v3258_v55 = vld [vmem:[%s3342_s23] ss:$0 sm:$0xff]  ;;  %s3351_s23 = sld [smem:[#allocation13_spill]] }
  0x84   : > { %1710 = vmatpush.bf16.msrb.mxu2 %v2805_v58  ;;  %1789 = vmatpush.bf16.msrb.mxu3 %v2821_v59 }
  0x86   : > { %v2837_v47 = vld [vmem:[%s3351_s23 + $0x8] sm:$0xff] }
  0x88   : > { %1711 = vmatpush.bf16.msrb.mxu2 %v2804_v61  ;;  %1790 = vmatpush.bf16.msrb.mxu3 %v2820_v62 }
  0x8c   : > { %1712 = vmatpush.bf16.msrb.mxu2 %v2803_v0  ;;  %1791 = vmatpush.bf16.msrb.mxu3 %v2819_v1 }
  0x90   : > { %1713 = vmatpush.bf16.msrb.mxu2 %v2802_v3  ;;  %1792 = vmatpush.bf16.msrb.mxu3 %v2818_v4 }
  0xd7   : > { %v1255_v5 = vpop.f32.mrf.mxu0  ;;  %v1290_v6 = vpop.f32.mrf.mxu1 }
  0xd8   : > { %v1275_v7 = vpack.c.bf16 %v1255_v5, %v1255_v5  ;;  %v1310_v8 = vpack.c.bf16 %v1290_v6, %v1290_v6 }
  0xda   : > { %2523 = vmatmul.msk.bf16.vlgmr.msra.gmra.mxu2 %vm1358_vm5, %v1310_v8  ;;  %2556 = vmatmul.msk.bf16.vlgmr.msra.gmra.mxu3 %vm1358_vm5, %v1275_v7 }
  0xdb   : > { %2623 = vmatmul.msk.bf16.vlgmr.msra.gmra.mxu0 %vm1358_vm5, %v1310_v8  ;;  %1923 = vmatpush.bf16.msra.mxu3 %v2826_v15 }
  0xdc   : > { %1901 = vmatpush.bf16.msra.mxu2 %v2827_v53 }
  0xdf   : > { %v1257_v9 = vpop.f32.mrf.mxu0  ;;  %v1292_v10 = vpop.f32.mrf.mxu1 }
  0xe0   : > { %v2895_v9 = vld [vmem:[%s3343_s2] ss:$0 sm:$0xff]  ;;  %s1222_s2 = scalar_lea.vmem %s3156_s6, %s3359_s1 }
  0xe7   : > { %v1462_v11 = vpop.f32.mrf.mxu0 }
  0xe8   : > { %v1482_v12 = vpack.c.bf16 %v1462_v11, %v1462_v11  ;;  %v2896_v11 = vld [vmem:[%s3344_s7] ss:$0 sm:$0xff]  ;;  %s3354_s7 = sld [smem:[#allocation23_spill]] }
  0xea   : > { %2590 = vmatmul.msk.bf16.vlgmr.msrb.gmra.mxu1 %vm1358_vm5, %v1482_v12  ;;  %2656 = vmatmul.msk.bf16.vlgmr.msrb.gmra.mxu2 %vm1358_vm5, %v1275_v7 }
  0xeb   : > { %2689 = vmatmul.msk.bf16.vlgmr.msrb.gmra.mxu3 %vm1358_vm5, %v1482_v12  ;;  %2003 = vmatpush.bf16.msrb.mxu2 %v2829_v54 }
  0xef   : > { %v1464_v13 = vpop.f32.mrf.mxu0 }
 0x158   : > { %v1652_v16 = vpop.f32.mrf.mxu0 }
 0x15d   : > { %v1378_v17 = vpop.f32.mrf.mxu2  ;;  %v1444_v18 = vpop.f32.mrf.mxu3 }
 0x15e   : > { %v1445_v22 = vadd.f32 %v1444_v18, %v1378_v17 }
 0x160   : > { %v1654_v19 = vpop.f32.mrf.mxu0 }
 0x165   : > { %v1380_v20 = vpop.f32.mrf.mxu2  ;;  %v1446_v21 = vpop.f32.mrf.mxu3 }
 0x167   : > { %v1545_v24 = vpop.f32.mrf.mxu1 }
 0x168   : > { %v1549_v25 = vadd.f32 %v1545_v24, %v1445_v22  ;;  %v2835_v22 = vld [vmem:[%s3345_s10 + $0x8] sm:$0xff]  ;;  %v2834_v24 = vld [vmem:[%s3345_s10] sm:$0xff] }
 0x16a   : > { %v1554_v27 = vmul.f32 %v2890_v23, %v1549_v25  ;;  %v2833_v23 = vld [vmem:[%s3346_s11 + $0x8] sm:$0xff] }
 0x16c   : > { %v1559_v28 = vadd.f32 %v2891_v26, %v1554_v27  ;;  %v2832_v27 = vld [vmem:[%s3346_s11] sm:$0xff] }
 0x16d   : > { %v1715_v29 = vpop.f32.mrf.mxu2 }
 0x16e   : > { %v1560_v30 = vmax.f32 %v1559_v28, 0.0  ;;  %v1716_v31 = vadd.f32 %v1715_v29, %v1652_v16  ;;  %v1794_v32 = vpop.f32.mrf.mxu3  ;;  %v2831_v28 = vld [vmem:[%s3347_s15 + $0x8] sm:$0xff]  ;;  %v2830_v29 = vld [vmem:[%s3347_s15] sm:$0xff] }
 0x16f   : > { %v1547_v34 = vpop.f32.mrf.mxu1 }
 0x170   : > { %v1810_v36 = vpack.c.bf16 %v1560_v30, %v1560_v30  ;;  %v1798_v37 = vadd.f32 %v1794_v32, %v1716_v31  ;;  %v2838_v31 = vld [vmem:[%s3348_s16] sm:$0xff]  ;;  %s3355_s16 = sld [smem:[#allocation7_spill]] }
 0x171   : > { %v2897_v32 = vld [vmem:[%s3349_s18] ss:$0 sm:$0xff]  ;;  %s3356_s18 = sld [smem:[#allocation3_spill]] }
 0x172   : > { %v1803_v39 = vmul.f32 %v2892_v33, %v1798_v37  ;;  %2694 = vmatmul.msk.bf16.vlgmr.msra.gmra.mxu1 %vm1820_vm6, %v1810_v36  ;;  %v1848_v41 = vsel %vm1239_vm0, %v1810_v36, 0  ;;  %v2898_v33 = vld [vmem:[%s3350_s22] ss:$0 sm:$0xff]  ;;  %s3357_s22 = sld [smem:[#allocation22_spill]] }
 0x173   : > { %1857 = vmatpush.bf16.msrb.mxu0 %v1848_v41  ;;  %1876 = vmatpush.bf16.msrb.mxu1 %v1848_v41 }
 0x174   : > { %2027 = vmatpush.bf16.msrb.mxu3 %v1848_v41  ;;  %v1808_v44 = vadd.f32 %v2893_v40, %v1803_v39 }
 0x175   : > { %v1717_v43 = vpop.f32.mrf.mxu2 }
 0x176   : > { %v1796_v45 = vpop.f32.mrf.mxu3  ;;  %2695 = vmatmul.msk.bf16.vlgmr.msrb.gmra.mxu0 %vm1844_vm7, %v1843_v42  ;;  %v1809_v46 = vmax.f32 %v1808_v44, 0.0 }
 0x177   : > { %1941 = vmatpush.bf16.msra.mxu0 %v1848_v41  ;;  %1966 = vmatpush.bf16.msra.mxu1 %v2828_v38 }
 0x178   : > { %v1841_v49 = vpack.c.bf16 %v1809_v46, %v1809_v46 }
 0x17a   : > { %v2058_v51 = vsel %vm1239_vm0, %v1841_v49, 0 }
 0x17b   : > { %2044 = vmatpush.bf16.msrb.mxu0 %v2777_v14 }
 0x182   : > { %2696 = vmatmul.msk.bf16.vlgmr.msrb.gmra.mxu1 %vm1844_vm7, %v1840_v48 }
 0x183   : > { %2067 = vmatpush.bf16.msrb.mxu1 %v2058_v51 }
 0x186   : > { %2707 = vmatmul.msk.bf16.vlgmr.msra.gmra.mxu0 %vm1844_vm7, %v1930_v52 }
 0x187   : > { %2151 = vmatpush.bf16.msra.mxu0 %v2831_v28 }
 0x18b   : > { %2152 = vmatpush.bf16.msra.mxu0 %v2830_v29 }
 0x1ef   : > { %v1833_v56 = vpop.f32.mrf.mxu1 }
 0x1f0   : > { %v1834_v57 = vadd.f32 %v3258_v55, %v1833_v56  ;;  %v2899_v56 = vld [vmem:[%s3352_s26] ss:$0 sm:$0xff]  ;;  %s1225_s26 = scalar_lea.vmem %s3161_s30, %s3359_s1 }
 0x1f2   : > { %1838 = vst.msk [vmem:[%s1219_s0] sm:$0x7] %vm1837_vm8, %v1834_v57  ;;  %s3353_s0 = sld [smem:[#allocation5_spill]] }
 0x1f3   : > { %v1859_v58 = vpop.f32.mrf.mxu0 }
 0x1f4   : > { %v1865_v59 = vpack.c.bf16 %v1859_v58, %v1859_v58 }
 0x1f6   : > { %2706 = vmatmul.msk.bf16.vlgmr.msra.gmra.mxu3 %vm1820_vm6, %v1865_v59 }
 0x1f7   : > { %v1835_v60 = vpop.f32.mrf.mxu1  ;;  %2123 = vmatpush.bf16.msra.mxu3 %v2833_v23 }
 0x1f8   : > { %v2900_v58 = vld [vmem:[%s3353_s0] ss:$0 sm:$0xff] }
 0x1fb   : > { %v1861_v61 = vpop.f32.mrf.mxu0  ;;  %2124 = vmatpush.bf16.msra.mxu3 %v2832_v27 }
 0x1ff   : > { %v1878_v62 = vpop.f32.mrf.mxu1 }
 0x200   : > { %v1884_v63 = vpack.c.bf16 %v1878_v62, %v1878_v62 }
 0x202   : > { %2701 = vmatmul.msk.bf16.vlgmr.msra.gmra.mxu2 %vm1820_vm6, %v1884_v63 }
 0x203   : > { %2090 = vmatpush.bf16.msra.mxu2 %v2058_v51  ;;  %v1943_v0 = vpop.f32.mrf.mxu0 }
 0x204   : > { %v1949_v1 = vpack.c.bf16 %v1943_v0, %v1943_v0 }
 0x206   : > { %2712 = vmatmul.msk.bf16.vlgmr.msra.gmra.mxu1 %vm1820_vm6, %v1949_v1  ;;  %2718 = vmatmul.msk.bf16.vlgmr.msrb.gmra.mxu3 %vm1844_vm7, %v1840_v48 }
 0x207   : > { %2170 = vmatpush.bf16.msra.mxu1 %v2058_v51  ;;  %v1880_v2 = vpop.f32.mrf.mxu1  ;;  %2241 = vmatpush.bf16.msrb.mxu3 %v2838_v31 }
 0x20b   : > { %v1945_v3 = vpop.f32.mrf.mxu0 }
 0x20c   : > { %v2840_v3 = vld [vmem:[%s3354_s7 + $0x8] sm:$0xff] }
 0x216   : > { %2720 = vmatmul.msk.bf16.vlgmr.msrb.gmra.mxu1 %vm1844_vm7, %v1843_v42 }
 0x217   : > { %2293 = vmatpush.bf16.msrb.mxu1 %v2058_v51 }
 0x226   : > { %2740 = vmatmul.msk.bf16.vlgmr.msra.gmra.mxu1 %vm1844_vm7, %v1930_v52 }
 0x236   : > { %2764 = vmatmul.msk.bf16.vlgmr.msrb.gmra.mxu1 %vm1844_vm7, %v1840_v48 }
 0x279   : > { %v1925_v4 = vpop.f32.mrf.mxu3 }
 0x281   : > { %v1927_v5 = vpop.f32.mrf.mxu3 }
 0x283   : > { %v1968_v6 = vpop.f32.mrf.mxu1 }
 0x285   : > { %v1903_v7 = vpop.f32.mrf.mxu2 }
 0x286   : > { %v1926_v8 = vadd.f32 %v1925_v4, %v1903_v7  ;;  %v2839_v4 = vld [vmem:[%s3354_s7] sm:$0xff] }
 0x288   : > { %v1972_v10 = vadd.f32 %v1968_v6, %v1926_v8  ;;  %v2901_v6 = vld [vmem:[%s3355_s16] ss:$0 sm:$0xff] }
 0x289   : > { %v2029_v19 = vpop.f32.mrf.mxu3 }
 0x28a   : > { %v1977_v12 = vmul.f32 %v2895_v9, %v1972_v10  ;;  %v2902_v9 = vld [vmem:[%s3356_s18] ss:$0 sm:$0xff] }
 0x28b   : > { %v1970_v13 = vpop.f32.mrf.mxu1 }
 0x28c   : > { %v1982_v14 = vadd.f32 %v2896_v11, %v1977_v12 }
 0x28d   : > { %v1905_v15 = vpop.f32.mrf.mxu2 }
 0x28e   : > { %v1983_v16 = vmax.f32 %v1982_v14, 0.0 }
 0x290   : > { %v1986_v17 = vpack.c.bf16 %v1983_v16, %v1983_v16  ;;  %v2903_v16 = vld [vmem:[%s3357_s22] ss:$0 sm:$0xff] }
 0x291   : > { %v2031_v21 = vpop.f32.mrf.mxu3 }
 0x292   : > { %2717 = vmatmul.msk.bf16.vlgmr.msrb.gmra.mxu2 %vm1820_vm6, %v1986_v17 }
 0x293   : > { %v2069_v18 = vpop.f32.mrf.mxu1  ;;  %2202 = vmatpush.bf16.msrb.mxu2 %v2835_v22 }
 0x294   : > { %v2077_v44 = vpack.c.bf16 %v2069_v18, %v2069_v18 }
 0x297   : > { %2203 = vmatpush.bf16.msrb.mxu2 %v2834_v24 }
 0x29b   : > { %v2071_v20 = vpop.f32.mrf.mxu1 }
 0x2a2   : > { %2721 = vmatmul.msk.bf16.vlgmr.msra.gmra.mxu2 %vm1844_vm7, %v1840_v48  ;;  %v2836_v48 = vld [vmem:[%s3351_s23] sm:$0xff] }
 0x2a3   : > { %v2172_v25 = vpop.f32.mrf.mxu1  ;;  %2329 = vmatpush.bf16.msra.mxu2 %v2840_v3 }
 0x2a4   : > { %v2180_v26 = vpack.c.bf16 %v2172_v25, %v2172_v25 }
 0x2a7   : > { %2330 = vmatpush.bf16.msra.mxu2 %v2839_v4 }
 0x2ab   : > { %v2174_v30 = vpop.f32.mrf.mxu1 }
 0x2b2   : > { %2749 = vmatmul.msk.bf16.vlgmr.msrb.gmra.mxu2 %vm2113_vm9, %v2180_v26 }
 0x2b3   : > { %v2295_v2 = vpop.f32.mrf.mxu1 }
 0x2bb   : > { %v2297_v5 = vpop.f32.mrf.mxu1 }
 0x315   : > { %v2005_v34 = vpop.f32.mrf.mxu2 }
 0x316   : > { %v2013_v35 = vmul.f32 %v2897_v32, %v2005_v34 }
 0x318   : > { %v2018_v36 = vadd.f32 %v2898_v33, %v2013_v35 }
 0x31a   : > { %v2019_v37 = vmax.f32 %v2018_v36, 0.0 }
 0x31c   : > { %v2030_v38 = vadd.f32 %v2029_v19, %v2019_v37 }
 0x31d   : > { %v2007_v39 = vpop.f32.mrf.mxu2 }
 0x31e   : > { %v2033_v40 = vpack.c.bf16 %v2030_v38, %v2030_v38 }
 0x320   : > { %2719 = vmatmul.msk.bf16.vlgmr.msrb.gmra.mxu0 %vm1820_vm6, %v2033_v40 }
 0x321   : > { %2268 = vmatpush.bf16.msrb.mxu0 %v2837_v47 }
 0x325   : > { %v2092_v41 = vpop.f32.mrf.mxu2  ;;  %2269 = vmatpush.bf16.msrb.mxu0 %v2836_v48 }
 0x326   : > { %v2100_v42 = vpack.c.bf16 %v2092_v41, %v2092_v41 }
 0x328   : > { %2730 = vmatmul.msk.bf16.vlgmr.msra.gmra.mxu3 %vm2113_vm9, %v2100_v42 }
 0x32d   : > { %v2094_v43 = vpop.f32.mrf.mxu2 }
 0x330   : > { %2739 = vmatmul.msk.bf16.vlgmr.msra.gmra.mxu0 %vm2113_vm9, %v2077_v44 }
 0x335   : > { %v2205_v45 = vpop.f32.mrf.mxu2 }
 0x338   : > { %2754 = vmatmul.msk.bf16.vlgmr.msrb.gmra.mxu3 %vm1820_vm6, %v2033_v40 }
 0x33d   : > { %v2207_v46 = vpop.f32.mrf.mxu2 }
 0x39d   : > { %v2046_v49 = vpop.f32.mrf.mxu0 }
 0x39e   : > { %v2047_v50 = vadd.f32 %v3258_v55, %v2046_v49 }
 0x3a0   : > { %2051 = vst.msk [vmem:[%s1222_s2] sm:$0x1] %vm2050_vm10, %v2047_v50 }
 0x3a5   : > { %v2048_v51 = vpop.f32.mrf.mxu0 }
 0x3ab   : > { %v2126_v52 = vpop.f32.mrf.mxu3 }
 0x3ad   : > { %v2154_v53 = vpop.f32.mrf.mxu0 }
 0x3ae   : > { %v2155_v54 = vadd.f32 %v2154_v53, %v2126_v52 }
 0x3b0   : > { %v2209_v57 = vadd.f32 %v2205_v45, %v2155_v54 }
 0x3b2   : > { %v2214_v59 = vmul.f32 %v2899_v56, %v2209_v57 }
 0x3b3   : > { %v2128_v60 = vpop.f32.mrf.mxu3 }
 0x3b4   : > { %v2219_v61 = vadd.f32 %v2900_v58, %v2214_v59 }
 0x3b5   : > { %v2156_v62 = vpop.f32.mrf.mxu0 }
 0x3b6   : > { %v2220_v63 = vmax.f32 %v2219_v61, 0.0 }
 0x3b8   : > { %v2225_v0 = vpack.c.bf16 %v2220_v63, %v2220_v63 }
 0x3ba   : > { %2763 = vmatmul.msk.bf16.vlgmr.msrb.gmra.mxu0 %vm2113_vm9, %v2225_v0 }
 0x3bb   : > { %v2243_v55 = vpop.f32.mrf.mxu3 }
 0x3c3   : > { %v2245_v1 = vpop.f32.mrf.mxu3 }
 0x437   : > { %v2271_v7 = vpop.f32.mrf.mxu0 }
 0x438   : > { %v2272_v8 = vadd.f32 %v2271_v7, %v2243_v55 }
 0x43a   : > { %v2279_v10 = vmul.f32 %v2901_v6, %v2272_v8 }
 0x43c   : > { %v2284_v11 = vadd.f32 %v2902_v9, %v2279_v10 }
 0x43e   : > { %v2285_v12 = vmax.f32 %v2284_v11, 0.0 }
 0x43f   : > { %v2273_v13 = vpop.f32.mrf.mxu0 }
 0x440   : > { %v2296_v14 = vadd.f32 %v2295_v2, %v2285_v12 }
 0x442   : > { %v2303_v15 = vpack.c.bf16 %v2296_v14, %v2296_v14 }
 0x444   : > { %2773 = vmatmul.msk.bf16.vlgmr.msra.gmra.mxu2 %vm2113_vm9, %v2303_v15 }
 0x4c7   : > { %v2332_v17 = vpop.f32.mrf.mxu2 }
 0x4c8   : > { %v2333_v18 = vadd.f32 %v2903_v16, %v2332_v17 }
 0x4ca   : > { %2337 = vst.msk [vmem:[%s1225_s26] sm:$0x1] %vm2336_vm11, %v2333_v18 }
 0x4cf   : > { %v2334_v19 = vpop.f32.mrf.mxu2 }
 0x4d0 PF: > { %s92_s28 = sadd.s32 1, %s2910_s28  }
 0x4d1   : > { %p89_p4 = scmp.ge.s32.totalorder %s92_s28, 4  }
 0x4d3   :  { %91 = sbr.rel (!%p89_p4) target bundleno = 69 (0x45), region = 266 }

</bundles_post_ra>
